<compile_context>
chip_gen: v7x
topology: tpu7x:2x2x1
jax: 0.10.0
libtpu: 0.0.40
codegen_flags: <defaults>
</compile_context>

<pallas_src>
import functools

import jax
import jax.numpy as jnp
from jax import lax
from jax.experimental import pallas as pl
from jax.experimental.pallas import tpu as pltpu


# ----------------------------------------------------------------------------
# Kernel A: conv3x3(stride 2, pad 1) + BN + ReLU   and   conv1x1(stride 2) + BN
# ----------------------------------------------------------------------------
def _head_kernel(xs_ref, w1_ref, s1_ref, b1_ref, wsc_ref, ssc_ref, bsc_ref,
                 hpad_ref, sc_ref, *, ho, wo):
    """xs_ref: [1, 4, ho+1, wo+1, cin] phase-decomposed padded input.

    Phase p*2+q holds x_pad[2i+p, 2j+q, :], so the stride-2 3x3 conv becomes
    nine contiguous shift-and-accumulate matmuls (no strided access anywhere).
    """
    cin = xs_ref.shape[-1]
    cout = w1_ref.shape[-1]

    # The four stride-2 phase planes, loaded once into vregs / VMEM values.
    planes = [xs_ref[0, i] for i in range(4)]            # each [ho+1, wo+1, cin]

    acc = jnp.zeros((ho * wo, cout), jnp.float32)
    for kh in range(3):
        p, a = kh % 2, kh // 2
        for kw in range(3):
            q, c = kw % 2, kw // 2
            patch = planes[p * 2 + q][a:a + ho, c:c + wo, :]      # [ho, wo, cin]
            acc = acc + jnp.dot(patch.reshape(ho * wo, cin),
                                w1_ref[kh * 3 + kw],
                                preferred_element_type=jnp.float32)
    h = jnp.maximum(acc * s1_ref[...] + b1_ref[...], 0.0)

    # Shortcut: 1x1 stride-2 conv reads phase (1,1) == x[2i, 2j, :] (pad offset 1).
    xc = planes[3][0:ho, 0:wo, :]
    sc = (jnp.dot(xc.reshape(ho * wo, cin), wsc_ref[...],
                  preferred_element_type=jnp.float32)
          * ssc_ref[...] + bsc_ref[...])

    # Write h with a fused zero border so kernel B needs no separate pad op.
    hpad_ref[0] = jnp.zeros((ho + 2, wo + 2, cout), hpad_ref.dtype)
    hpad_ref[0, pl.ds(1, ho), pl.ds(1, wo), :] = (
        h.reshape(ho, wo, cout).astype(hpad_ref.dtype))
    sc_ref[0] = sc.reshape(ho, wo, cout).astype(sc_ref.dtype)


def _head_call(xs, w1, s1, b1, wsc, ssc, bsc, *, ho, wo):
    B, nph, hp2, wp2, cin = xs.shape
    cout = w1.shape[-1]
    kernel = functools.partial(_head_kernel, ho=ho, wo=wo)
    return pl.pallas_call(
        kernel,
        grid=(B,),
        in_specs=[
            pl.BlockSpec((1, nph, hp2, wp2, cin), lambda b: (b, 0, 0, 0, 0)),
            pl.BlockSpec((9, cin, cout), lambda b: (0, 0, 0)),
            pl.BlockSpec((1, cout), lambda b: (0, 0)),
            pl.BlockSpec((1, cout), lambda b: (0, 0)),
            pl.BlockSpec((cin, cout), lambda b: (0, 0)),
            pl.BlockSpec((1, cout), lambda b: (0, 0)),
            pl.BlockSpec((1, cout), lambda b: (0, 0)),
        ],
        out_specs=(
            pl.BlockSpec((1, ho + 2, wo + 2, cout), lambda b: (b, 0, 0, 0)),
            pl.BlockSpec((1, ho, wo, cout), lambda b: (b, 0, 0, 0)),
        ),
        out_shape=(
            jax.ShapeDtypeStruct((B, ho + 2, wo + 2, cout), jnp.float32),
            jax.ShapeDtypeStruct((B, ho, wo, cout), jnp.float32),
        ),
        compiler_params=pltpu.CompilerParams(
            dimension_semantics=("parallel",)),
    )(xs, w1, s1, b1, wsc, ssc, bsc)


# ----------------------------------------------------------------------------
# Kernel B: conv3x3(stride 1, pad 1) + BN + residual add + ReLU
# ----------------------------------------------------------------------------
def _tail_kernel(hpad_ref, w2_ref, s2_ref, b2_ref, sc_ref, o_ref, *, ho, wo):
    c = w2_ref.shape[-1]
    hp = hpad_ref[0]                                     # [ho+2, wo+2, c]
    acc = jnp.zeros((ho * wo, c), jnp.float32)
    for kh in range(3):
        for kw in range(3):
            patch = hp[kh:kh + ho, kw:kw + wo, :]        # [ho, wo, c]
            acc = acc + jnp.dot(patch.reshape(ho * wo, c),
                                w2_ref[kh * 3 + kw],
                                preferred_element_type=jnp.float32)
    out = acc * s2_ref[...] + b2_ref[...] + sc_ref[0].reshape(ho * wo, c)
    o_ref[0] = jnp.maximum(out, 0.0).reshape(ho, wo, c).astype(o_ref.dtype)


def _tail_call(hpad, w2, s2, b2, sc, *, ho, wo):
    B = hpad.shape[0]
    c = w2.shape[-1]
    kernel = functools.partial(_tail_kernel, ho=ho, wo=wo)
    return pl.pallas_call(
        kernel,
        grid=(B,),
        in_specs=[
            pl.BlockSpec((1, ho + 2, wo + 2, c), lambda b: (b, 0, 0, 0)),
            pl.BlockSpec((9, c, c), lambda b: (0, 0, 0)),
            pl.BlockSpec((1, c), lambda b: (0, 0)),
            pl.BlockSpec((1, c), lambda b: (0, 0)),
            pl.BlockSpec((1, ho, wo, c), lambda b: (b, 0, 0, 0)),
        ],
        out_specs=pl.BlockSpec((1, ho, wo, c), lambda b: (b, 0, 0, 0)),
        out_shape=jax.ShapeDtypeStruct((B, ho, wo, c), jnp.float32),
        compiler_params=pltpu.CompilerParams(
            dimension_semantics=("parallel",)),
    )(hpad, w2, s2, b2, sc)


# ----------------------------------------------------------------------------
# Parameters: raw (PyTorch layout) and kernel-ready (folded / relaid-out, once)
# ----------------------------------------------------------------------------
def init_raw_params(key, in_channels, out_channels):
    ks = jax.random.split(key, 6)

    def bn_params(k, c):
        k1, k2, k3, k4 = jax.random.split(k, 4)
        gamma = 1.0 + 0.1 * jax.random.normal(k1, (c,), jnp.float32)
        beta = 0.1 * jax.random.normal(k2, (c,), jnp.float32)
        mean = 0.1 * jax.random.normal(k3, (c,), jnp.float32)
        var = jax.random.uniform(k4, (c,), jnp.float32, 0.5, 1.5)
        return gamma, beta, mean, var

    return {
        "w1": 0.1 * jax.random.normal(ks[0], (out_channels, in_channels, 3, 3), jnp.float32),
        "w2": 0.1 * jax.random.normal(ks[1], (out_channels, out_channels, 3, 3), jnp.float32),
        "wsc": 0.1 * jax.random.normal(ks[2], (out_channels, in_channels, 1, 1), jnp.float32),
        "bn1": bn_params(ks[3], out_channels),
        "bn2": bn_params(ks[4], out_channels),
        "bnsc": bn_params(ks[5], out_channels),
    }


def prepare_params(raw, eps=1e-5):
    """Hoisted (one-time) weight relayout + BatchNorm folding -> kernel layout."""
    def fold(bn):
        g, b, m, v = bn
        scale = g / jnp.sqrt(v + eps)
        shift = b - m * scale
        return scale.reshape(1, -1), shift.reshape(1, -1)

    cout, cin = raw["w1"].shape[0], raw["w1"].shape[1]
    w1k = jnp.transpose(raw["w1"], (2, 3, 1, 0)).reshape(9, cin, cout)
    w2k = jnp.transpose(raw["w2"], (2, 3, 1, 0)).reshape(9, cout, cout)
    wsck = raw["wsc"].reshape(cout, cin).T
    s1, b1 = fold(raw["bn1"])
    s2, b2 = fold(raw["bn2"])
    ssc, bsc = fold(raw["bnsc"])
    return {"w1": w1k, "w2": w2k, "wsc": wsck,
            "s1": s1, "b1": b1, "s2": s2, "b2": b2, "ssc": ssc, "bsc": bsc}


# ----------------------------------------------------------------------------
# Forward pass
# ----------------------------------------------------------------------------
@jax.jit
def residual_block_2_forward(params, x):
    """x: [B, Cin, H, W] (NCHW, H/W even) -> [B, Cout, H//2, W//2]."""
    B, cin, H, W = x.shape
    assert H % 2 == 0 and W % 2 == 0, "even spatial dims required"
    cout = params["w1"].shape[-1]
    ho, wo = H // 2, W // 2

    # Single wrapper relayout (~1x input bytes): pad by 1 and space-to-depth
    # into phase planes xs[b, p*2+q, i, j, c] = x_pad[b, c, 2i+p, 2j+q].
    xp = jnp.pad(x, ((0, 0), (0, 0), (1, 1), (1, 1)))
    xs = xp.reshape(B, cin, ho + 1, 2, wo + 1, 2)
    xs = jnp.transpose(xs, (0, 3, 5, 2, 4, 1)).reshape(B, 4, ho + 1, wo + 1, cin)

    h_pad, sc = _head_call(xs, params["w1"], params["s1"], params["b1"],
                           params["wsc"], params["ssc"], params["bsc"],
                           ho=ho, wo=wo)
    y = _tail_call(h_pad, params["w2"], params["s2"], params["b2"], sc,
                   ho=ho, wo=wo)                      # [B, ho, wo, cout] NHWC
    return jnp.transpose(y, (0, 3, 1, 2))             # back to NCHW at boundary


# ----------------------------------------------------------------------------
# Plain-JAX reference (eval-mode BN), for correctness check
# ----------------------------------------------------------------------------
def _reference_forward(raw, x, eps=1e-5):
    dn = ("NCHW", "OIHW", "NCHW")

    def bn(z, p):
        g, b, m, v = p
        return ((z - m[None, :, None, None]) / jnp.sqrt(v[None, :, None, None] + eps)
                * g[None, :, None, None] + b[None, :, None, None])

    h = lax.conv_general_dilated(x, raw["w1"], (2, 2), ((1, 1), (1, 1)),
                                 dimension_numbers=dn)
    h = jnp.maximum(bn(h, raw["bn1"]), 0.0)
    x1 = lax.conv_general_dilated(h, raw["w2"], (1, 1), ((1, 1), (1, 1)),
                                  dimension_numbers=dn)
    x1 = bn(x1, raw["bn2"])
    x2 = lax.conv_general_dilated(x, raw["wsc"], (2, 2), ((0, 0), (0, 0)),
                                  dimension_numbers=dn)
    x2 = bn(x2, raw["bnsc"])
    return jnp.maximum(x1 + x2, 0.0)


if __name__ == "__main__":
    key = jax.random.PRNGKey(0)
    pkey, xkey = jax.random.split(key)

    B, in_channels, out_channels, H, W = 2, 4, 8, 16, 16
    raw = init_raw_params(pkey, in_channels, out_channels)
    params = prepare_params(raw)            # one-time: fold BN, relayout weights
    x = jax.random.normal(xkey, (B, in_channels, H, W), dtype=jnp.float32)

    out = residual_block_2_forward(params, x)
    jax.block_until_ready(out)
    assert out.shape == (B, out_channels, H // 2, W // 2), out.shape

    ref = _reference_forward(raw, x)
    assert jnp.allclose(out, ref, atol=1e-3, rtol=1e-3), \
        float(jnp.max(jnp.abs(out - ref)))

    print("KERNEL_OK")
</pallas_src>

<mosaic_0001>
module attributes {stable_mosaic.version = 11 : i64} {
  func.func @_head_kernel(%arg0: i32, %arg1: memref<1x4x9x9x4xf32, #tpu.memory_space<vmem>>, %arg2: memref<9x4x8xf32, #tpu.memory_space<vmem>>, %arg3: memref<1x8xf32, #tpu.memory_space<vmem>>, %arg4: memref<1x8xf32, #tpu.memory_space<vmem>>, %arg5: memref<4x8xf32, #tpu.memory_space<vmem>>, %arg6: memref<1x8xf32, #tpu.memory_space<vmem>>, %arg7: memref<1x8xf32, #tpu.memory_space<vmem>>, %arg8: memref<1x10x10x8xf32, #tpu.memory_space<vmem>>, %arg9: memref<1x8x8x8xf32, #tpu.memory_space<vmem>>) attributes {dimension_semantics = [#tpu.dimension_semantics<parallel>], iteration_bounds = array<i64: 2>, scalar_prefetch = 0 : i64, scratch_operands = 0 : i64, tpu.core_type = #tpu.core_type<tc>, window_params = [{transform_indices = @transform_0, window_bounds = array<i64: 1, 4, 9, 9, 4>}, {pipeline_mode = #tpu.pipeline_mode<synchronous>, transform_indices = @transform_1, window_bounds = array<i64: 9, 4, 8>}, {pipeline_mode = #tpu.pipeline_mode<synchronous>, transform_indices = @transform_2, window_bounds = array<i64: 1, 8>}, {pipeline_mode = #tpu.pipeline_mode<synchronous>, transform_indices = @transform_3, window_bounds = array<i64: 1, 8>}, {pipeline_mode = #tpu.pipeline_mode<synchronous>, transform_indices = @transform_4, window_bounds = array<i64: 4, 8>}, {pipeline_mode = #tpu.pipeline_mode<synchronous>, transform_indices = @transform_5, window_bounds = array<i64: 1, 8>}, {pipeline_mode = #tpu.pipeline_mode<synchronous>, transform_indices = @transform_6, window_bounds = array<i64: 1, 8>}, {transform_indices = @transform_7, window_bounds = array<i64: 1, 10, 10, 8>}, {transform_indices = @transform_8, window_bounds = array<i64: 1, 8, 8, 8>}]} {
    %c0 = arith.constant 0 : index
    %c0_0 = arith.constant 0 : index
    %c0_1 = arith.constant 0 : index
    %c0_2 = arith.constant 0 : index
    %c0_3 = arith.constant 0 : index
    %0 = vector.load %arg1[%c0, %c0_0, %c0_1, %c0_2, %c0_3] : memref<1x4x9x9x4xf32, #tpu.memory_space<vmem>>, vector<1x1x9x9x4xf32>
    %1 = vector.shape_cast %0 : vector<1x1x9x9x4xf32> to vector<9x9x4xf32>
    %c0_4 = arith.constant 0 : index
    %c1 = arith.constant 1 : index
    %c0_5 = arith.constant 0 : index
    %c0_6 = arith.constant 0 : index
    %c0_7 = arith.constant 0 : index
    %2 = vector.load %arg1[%c0_4, %c1, %c0_5, %c0_6, %c0_7] : memref<1x4x9x9x4xf32, #tpu.memory_space<vmem>>, vector<1x1x9x9x4xf32>
    %3 = vector.shape_cast %2 : vector<1x1x9x9x4xf32> to vector<9x9x4xf32>
    %c0_8 = arith.constant 0 : index
    %c2 = arith.constant 2 : index
    %c0_9 = arith.constant 0 : index
    %c0_10 = arith.constant 0 : index
    %c0_11 = arith.constant 0 : index
    %4 = vector.load %arg1[%c0_8, %c2, %c0_9, %c0_10, %c0_11] : memref<1x4x9x9x4xf32, #tpu.memory_space<vmem>>, vector<1x1x9x9x4xf32>
    %5 = vector.shape_cast %4 : vector<1x1x9x9x4xf32> to vector<9x9x4xf32>
    %c0_12 = arith.constant 0 : index
    %c3 = arith.constant 3 : index
    %c0_13 = arith.constant 0 : index
    %c0_14 = arith.constant 0 : index
    %c0_15 = arith.constant 0 : index
    %6 = vector.load %arg1[%c0_12, %c3, %c0_13, %c0_14, %c0_15] : memref<1x4x9x9x4xf32, #tpu.memory_space<vmem>>, vector<1x1x9x9x4xf32>
    %7 = vector.shape_cast %6 : vector<1x1x9x9x4xf32> to vector<9x9x4xf32>
    %cst = arith.constant 0.000000e+00 : f32
    %8 = vector.broadcast %cst : f32 to vector<64x8xf32>
    %9 = vector.extract_strided_slice %1 {offsets = [0, 0, 0], sizes = [8, 8, 4], strides = [1, 1, 1]} : vector<9x9x4xf32> to vector<8x8x4xf32>
    %10 = vector.shape_cast %9 : vector<8x8x4xf32> to vector<64x4xf32>
    %c0_16 = arith.constant 0 : index
    %c0_17 = arith.constant 0 : index
    %c0_18 = arith.constant 0 : index
    %11 = vector.load %arg2[%c0_16, %c0_17, %c0_18] : memref<9x4x8xf32, #tpu.memory_space<vmem>>, vector<1x4x8xf32>
    %12 = vector.shape_cast %11 : vector<1x4x8xf32> to vector<4x8xf32>
    %cst_19 = arith.constant dense<0.000000e+00> : vector<64x8xf32>
    %13 = tpu.matmul %10, %12, %cst_19 {dimension_numbers = #tpu.dot_dimension_numbers<[1], [0], [0], [1], [0, 0, 1, 1], [], []>} : vector<64x4xf32>, vector<4x8xf32>, vector<64x8xf32> -> vector<64x8xf32>
    %14 = arith.addf %8, %13 : vector<64x8xf32>
    %15 = vector.extract_strided_slice %3 {offsets = [0, 0, 0], sizes = [8, 8, 4], strides = [1, 1, 1]} : vector<9x9x4xf32> to vector<8x8x4xf32>
    %16 = vector.shape_cast %15 : vector<8x8x4xf32> to vector<64x4xf32>
    %c1_20 = arith.constant 1 : index
    %c0_21 = arith.constant 0 : index
    %c0_22 = arith.constant 0 : index
    %17 = vector.load %arg2[%c1_20, %c0_21, %c0_22] : memref<9x4x8xf32, #tpu.memory_space<vmem>>, vector<1x4x8xf32>
    %18 = vector.shape_cast %17 : vector<1x4x8xf32> to vector<4x8xf32>
    %cst_23 = arith.constant dense<0.000000e+00> : vector<64x8xf32>
    %19 = tpu.matmul %16, %18, %cst_23 {dimension_numbers = #tpu.dot_dimension_numbers<[1], [0], [0], [1], [0, 0, 1, 1], [], []>} : vector<64x4xf32>, vector<4x8xf32>, vector<64x8xf32> -> vector<64x8xf32>
    %20 = arith.addf %14, %19 : vector<64x8xf32>
    %21 = vector.extract_strided_slice %1 {offsets = [0, 1, 0], sizes = [8, 8, 4], strides = [1, 1, 1]} : vector<9x9x4xf32> to vector<8x8x4xf32>
    %22 = vector.shape_cast %21 : vector<8x8x4xf32> to vector<64x4xf32>
    %c2_24 = arith.constant 2 : index
    %c0_25 = arith.constant 0 : index
    %c0_26 = arith.constant 0 : index
    %23 = vector.load %arg2[%c2_24, %c0_25, %c0_26] : memref<9x4x8xf32, #tpu.memory_space<vmem>>, vector<1x4x8xf32>
    %24 = vector.shape_cast %23 : vector<1x4x8xf32> to vector<4x8xf32>
    %cst_27 = arith.constant dense<0.000000e+00> : vector<64x8xf32>
    %25 = tpu.matmul %22, %24, %cst_27 {dimension_numbers = #tpu.dot_dimension_numbers<[1], [0], [0], [1], [0, 0, 1, 1], [], []>} : vector<64x4xf32>, vector<4x8xf32>, vector<64x8xf32> -> vector<64x8xf32>
    %26 = arith.addf %20, %25 : vector<64x8xf32>
    %27 = vector.extract_strided_slice %5 {offsets = [0, 0, 0], sizes = [8, 8, 4], strides = [1, 1, 1]} : vector<9x9x4xf32> to vector<8x8x4xf32>
    %28 = vector.shape_cast %27 : vector<8x8x4xf32> to vector<64x4xf32>
    %c3_28 = arith.constant 3 : index
    %c0_29 = arith.constant 0 : index
    %c0_30 = arith.constant 0 : index
    %29 = vector.load %arg2[%c3_28, %c0_29, %c0_30] : memref<9x4x8xf32, #tpu.memory_space<vmem>>, vector<1x4x8xf32>
    %30 = vector.shape_cast %29 : vector<1x4x8xf32> to vector<4x8xf32>
    %cst_31 = arith.constant dense<0.000000e+00> : vector<64x8xf32>
    %31 = tpu.matmul %28, %30, %cst_31 {dimension_numbers = #tpu.dot_dimension_numbers<[1], [0], [0], [1], [0, 0, 1, 1], [], []>} : vector<64x4xf32>, vector<4x8xf32>, vector<64x8xf32> -> vector<64x8xf32>
    %32 = arith.addf %26, %31 : vector<64x8xf32>
    %33 = vector.extract_strided_slice %7 {offsets = [0, 0, 0], sizes = [8, 8, 4], strides = [1, 1, 1]} : vector<9x9x4xf32> to vector<8x8x4xf32>
    %34 = vector.shape_cast %33 : vector<8x8x4xf32> to vector<64x4xf32>
    %c4 = arith.constant 4 : index
    %c0_32 = arith.constant 0 : index
    %c0_33 = arith.constant 0 : index
    %35 = vector.load %arg2[%c4, %c0_32, %c0_33] : memref<9x4x8xf32, #tpu.memory_space<vmem>>, vector<1x4x8xf32>
    %36 = vector.shape_cast %35 : vector<1x4x8xf32> to vector<4x8xf32>
    %cst_34 = arith.constant dense<0.000000e+00> : vector<64x8xf32>
    %37 = tpu.matmul %34, %36, %cst_34 {dimension_numbers = #tpu.dot_dimension_numbers<[1], [0], [0], [1], [0, 0, 1, 1], [], []>} : vector<64x4xf32>, vector<4x8xf32>, vector<64x8xf32> -> vector<64x8xf32>
    %38 = arith.addf %32, %37 : vector<64x8xf32>
    %39 = vector.extract_strided_slice %5 {offsets = [0, 1, 0], sizes = [8, 8, 4], strides = [1, 1, 1]} : vector<9x9x4xf32> to vector<8x8x4xf32>
    %40 = vector.shape_cast %39 : vector<8x8x4xf32> to vector<64x4xf32>
    %c5 = arith.constant 5 : index
    %c0_35 = arith.constant 0 : index
    %c0_36 = arith.constant 0 : index
    %41 = vector.load %arg2[%c5, %c0_35, %c0_36] : memref<9x4x8xf32, #tpu.memory_space<vmem>>, vector<1x4x8xf32>
    %42 = vector.shape_cast %41 : vector<1x4x8xf32> to vector<4x8xf32>
    %cst_37 = arith.constant dense<0.000000e+00> : vector<64x8xf32>
    %43 = tpu.matmul %40, %42, %cst_37 {dimension_numbers = #tpu.dot_dimension_numbers<[1], [0], [0], [1], [0, 0, 1, 1], [], []>} : vector<64x4xf32>, vector<4x8xf32>, vector<64x8xf32> -> vector<64x8xf32>
    %44 = arith.addf %38, %43 : vector<64x8xf32>
    %45 = vector.extract_strided_slice %1 {offsets = [1, 0, 0], sizes = [8, 8, 4], strides = [1, 1, 1]} : vector<9x9x4xf32> to vector<8x8x4xf32>
    %46 = vector.shape_cast %45 : vector<8x8x4xf32> to vector<64x4xf32>
    %c6 = arith.constant 6 : index
    %c0_38 = arith.constant 0 : index
    %c0_39 = arith.constant 0 : index
    %47 = vector.load %arg2[%c6, %c0_38, %c0_39] : memref<9x4x8xf32, #tpu.memory_space<vmem>>, vector<1x4x8xf32>
    %48 = vector.shape_cast %47 : vector<1x4x8xf32> to vector<4x8xf32>
    %cst_40 = arith.constant dense<0.000000e+00> : vector<64x8xf32>
    %49 = tpu.matmul %46, %48, %cst_40 {dimension_numbers = #tpu.dot_dimension_numbers<[1], [0], [0], [1], [0, 0, 1, 1], [], []>} : vector<64x4xf32>, vector<4x8xf32>, vector<64x8xf32> -> vector<64x8xf32>
    %50 = arith.addf %44, %49 : vector<64x8xf32>
    %51 = vector.extract_strided_slice %3 {offsets = [1, 0, 0], sizes = [8, 8, 4], strides = [1, 1, 1]} : vector<9x9x4xf32> to vector<8x8x4xf32>
    %52 = vector.shape_cast %51 : vector<8x8x4xf32> to vector<64x4xf32>
    %c7 = arith.constant 7 : index
    %c0_41 = arith.constant 0 : index
    %c0_42 = arith.constant 0 : index
    %53 = vector.load %arg2[%c7, %c0_41, %c0_42] : memref<9x4x8xf32, #tpu.memory_space<vmem>>, vector<1x4x8xf32>
    %54 = vector.shape_cast %53 : vector<1x4x8xf32> to vector<4x8xf32>
    %cst_43 = arith.constant dense<0.000000e+00> : vector<64x8xf32>
    %55 = tpu.matmul %52, %54, %cst_43 {dimension_numbers = #tpu.dot_dimension_numbers<[1], [0], [0], [1], [0, 0, 1, 1], [], []>} : vector<64x4xf32>, vector<4x8xf32>, vector<64x8xf32> -> vector<64x8xf32>
    %56 = arith.addf %50, %55 : vector<64x8xf32>
    %57 = vector.extract_strided_slice %1 {offsets = [1, 1, 0], sizes = [8, 8, 4], strides = [1, 1, 1]} : vector<9x9x4xf32> to vector<8x8x4xf32>
    %58 = vector.shape_cast %57 : vector<8x8x4xf32> to vector<64x4xf32>
    %c8 = arith.constant 8 : index
    %c0_44 = arith.constant 0 : index
    %c0_45 = arith.constant 0 : index
    %59 = vector.load %arg2[%c8, %c0_44, %c0_45] : memref<9x4x8xf32, #tpu.memory_space<vmem>>, vector<1x4x8xf32>
    %60 = vector.shape_cast %59 : vector<1x4x8xf32> to vector<4x8xf32>
    %cst_46 = arith.constant dense<0.000000e+00> : vector<64x8xf32>
    %61 = tpu.matmul %58, %60, %cst_46 {dimension_numbers = #tpu.dot_dimension_numbers<[1], [0], [0], [1], [0, 0, 1, 1], [], []>} : vector<64x4xf32>, vector<4x8xf32>, vector<64x8xf32> -> vector<64x8xf32>
    %62 = arith.addf %56, %61 : vector<64x8xf32>
    %c0_47 = arith.constant 0 : index
    %c0_48 = arith.constant 0 : index
    %63 = vector.load %arg3[%c0_47, %c0_48] : memref<1x8xf32, #tpu.memory_space<vmem>>, vector<1x8xf32>
    %64 = vector.broadcast %63 : vector<1x8xf32> to vector<64x8xf32>
    %65 = arith.mulf %62, %64 : vector<64x8xf32>
    %c0_49 = arith.constant 0 : index
    %c0_50 = arith.constant 0 : index
    %66 = vector.load %arg4[%c0_49, %c0_50] : memref<1x8xf32, #tpu.memory_space<vmem>>, vector<1x8xf32>
    %67 = vector.broadcast %66 : vector<1x8xf32> to vector<64x8xf32>
    %68 = arith.addf %65, %67 : vector<64x8xf32>
    %cst_51 = arith.constant 0.000000e+00 : f32
    %69 = vector.broadcast %cst_51 : f32 to vector<64x8xf32>
    %70 = arith.maximumf %68, %69 : vector<64x8xf32>
    %71 = vector.extract_strided_slice %7 {offsets = [0, 0, 0], sizes = [8, 8, 4], strides = [1, 1, 1]} : vector<9x9x4xf32> to vector<8x8x4xf32>
    %72 = vector.shape_cast %71 : vector<8x8x4xf32> to vector<64x4xf32>
    %c0_52 = arith.constant 0 : index
    %c0_53 = arith.constant 0 : index
    %73 = vector.load %arg5[%c0_52, %c0_53] : memref<4x8xf32, #tpu.memory_space<vmem>>, vector<4x8xf32>
    %cst_54 = arith.constant dense<0.000000e+00> : vector<64x8xf32>
    %74 = tpu.matmul %72, %73, %cst_54 {dimension_numbers = #tpu.dot_dimension_numbers<[1], [0], [0], [1], [0, 0, 1, 1], [], []>} : vector<64x4xf32>, vector<4x8xf32>, vector<64x8xf32> -> vector<64x8xf32>
    %c0_55 = arith.constant 0 : index
    %c0_56 = arith.constant 0 : index
    %75 = vector.load %arg6[%c0_55, %c0_56] : memref<1x8xf32, #tpu.memory_space<vmem>>, vector<1x8xf32>
    %76 = vector.broadcast %75 : vector<1x8xf32> to vector<64x8xf32>
    %77 = arith.mulf %74, %76 : vector<64x8xf32>
    %c0_57 = arith.constant 0 : index
    %c0_58 = arith.constant 0 : index
    %78 = vector.load %arg7[%c0_57, %c0_58] : memref<1x8xf32, #tpu.memory_space<vmem>>, vector<1x8xf32>
    %79 = vector.broadcast %78 : vector<1x8xf32> to vector<64x8xf32>
    %80 = arith.addf %77, %79 : vector<64x8xf32>
    %cst_59 = arith.constant 0.000000e+00 : f32
    %81 = vector.broadcast %cst_59 : f32 to vector<10x10x8xf32>
    %c0_60 = arith.constant 0 : index
    %c0_61 = arith.constant 0 : index
    %c0_62 = arith.constant 0 : index
    %c0_63 = arith.constant 0 : index
    %82 = vector.load %arg8[%c0_60, %c0_61, %c0_62, %c0_63] : memref<1x10x10x8xf32, #tpu.memory_space<vmem>>, vector<1x10x10x8xf32>
    %83 = vector.shape_cast %82 : vector<1x10x10x8xf32> to vector<10x10x8xf32>
    %84 = vector.shape_cast %81 : vector<10x10x8xf32> to vector<1x10x10x8xf32>
    tpu.vector_store %arg8[%c0_60, %c0_61, %c0_62, %c0_63], %84 {strides = array<i32>} : memref<1x10x10x8xf32, #tpu.memory_space<vmem>>, vector<1x10x10x8xf32>,
    %85 = vector.shape_cast %70 : vector<64x8xf32> to vector<8x8x8xf32>
    %c0_64 = arith.constant 0 : index
    %c1_65 = arith.constant 1 : index
    %c1_66 = arith.constant 1 : index
    %c0_67 = arith.constant 0 : index
    %86 = vector.load %arg8[%c0_64, %c1_65, %c1_66, %c0_67] : memref<1x10x10x8xf32, #tpu.memory_space<vmem>>, vector<1x8x8x8xf32>
    %87 = vector.shape_cast %86 : vector<1x8x8x8xf32> to vector<8x8x8xf32>
    %88 = vector.shape_cast %85 : vector<8x8x8xf32> to vector<1x8x8x8xf32>
    tpu.vector_store %arg8[%c0_64, %c1_65, %c1_66, %c0_67], %88 {strides = array<i32>} : memref<1x10x10x8xf32, #tpu.memory_space<vmem>>, vector<1x8x8x8xf32>,
    %89 = vector.shape_cast %80 : vector<64x8xf32> to vector<8x8x8xf32>
    %c0_68 = arith.constant 0 : index
    %c0_69 = arith.constant 0 : index
    %c0_70 = arith.constant 0 : index
    %c0_71 = arith.constant 0 : index
    %90 = vector.load %arg9[%c0_68, %c0_69, %c0_70, %c0_71] : memref<1x8x8x8xf32, #tpu.memory_space<vmem>>, vector<1x8x8x8xf32>
    %91 = vector.shape_cast %90 : vector<1x8x8x8xf32> to vector<8x8x8xf32>
    %92 = vector.shape_cast %89 : vector<8x8x8xf32> to vector<1x8x8x8xf32>
    tpu.vector_store %arg9[%c0_68, %c0_69, %c0_70, %c0_71], %92 {strides = array<i32>} : memref<1x8x8x8xf32, #tpu.memory_space<vmem>>, vector<1x8x8x8xf32>,
    return
  }
  func.func @transform_0(%arg0: i32) -> (i32, i32, i32, i32, i32) {
    %c0_i32 = arith.constant 0 : i32
    %c0_i32_0 = arith.constant 0 : i32
    %c0_i32_1 = arith.constant 0 : i32
    %c0_i32_2 = arith.constant 0 : i32
    %c0_i32_3 = arith.constant 0 : i32
    return %arg0, %c0_i32, %c0_i32_0, %c0_i32_1, %c0_i32_2 : i32, i32, i32, i32, i32
  }
  func.func @transform_1(%arg0: i32) -> (i32, i32, i32) {
    %c0_i32 = arith.constant 0 : i32
    %c0_i32_0 = arith.constant 0 : i32
    %c0_i32_1 = arith.constant 0 : i32
    %c0_i32_2 = arith.constant 0 : i32
    return %c0_i32, %c0_i32_0, %c0_i32_1 : i32, i32, i32
  }
  func.func @transform_2(%arg0: i32) -> (i32, i32) {
    %c0_i32 = arith.constant 0 : i32
    %c0_i32_0 = arith.constant 0 : i32
    %c0_i32_1 = arith.constant 0 : i32
    return %c0_i32, %c0_i32_0 : i32, i32
  }
  func.func @transform_3(%arg0: i32) -> (i32, i32) {
    %c0_i32 = arith.constant 0 : i32
    %c0_i32_0 = arith.constant 0 : i32
    %c0_i32_1 = arith.constant 0 : i32
    return %c0_i32, %c0_i32_0 : i32, i32
  }
  func.func @transform_4(%arg0: i32) -> (i32, i32) {
    %c0_i32 = arith.constant 0 : i32
    %c0_i32_0 = arith.constant 0 : i32
    %c0_i32_1 = arith.constant 0 : i32
    return %c0_i32, %c0_i32_0 : i32, i32
  }
  func.func @transform_5(%arg0: i32) -> (i32, i32) {
    %c0_i32 = arith.constant 0 : i32
    %c0_i32_0 = arith.constant 0 : i32
    %c0_i32_1 = arith.constant 0 : i32
    return %c0_i32, %c0_i32_0 : i32, i32
  }
  func.func @transform_6(%arg0: i32) -> (i32, i32) {
    %c0_i32 = arith.constant 0 : i32
    %c0_i32_0 = arith.constant 0 : i32
    %c0_i32_1 = arith.constant 0 : i32
    return %c0_i32, %c0_i32_0 : i32, i32
  }
  func.func @transform_7(%arg0: i32) -> (i32, i32, i32, i32) {
    %c0_i32 = arith.constant 0 : i32
    %c0_i32_0 = arith.constant 0 : i32
    %c0_i32_1 = arith.constant 0 : i32
    %c0_i32_2 = arith.constant 0 : i32
    return %arg0, %c0_i32, %c0_i32_0, %c0_i32_1 : i32, i32, i32, i32
  }
  func.func @transform_8(%arg0: i32) -> (i32, i32, i32, i32) {
    %c0_i32 = arith.constant 0 : i32
    %c0_i32_0 = arith.constant 0 : i32
    %c0_i32_1 = arith.constant 0 : i32
    %c0_i32_2 = arith.constant 0 : i32
    return %arg0, %c0_i32, %c0_i32_0, %c0_i32_1 : i32, i32, i32, i32
  }
}

module attributes {stable_mosaic.version = 11 : i64} {
  func.func @_tail_kernel(%arg0: i32, %arg1: memref<1x10x10x8xf32, #tpu.memory_space<vmem>>, %arg2: memref<9x8x8xf32, #tpu.memory_space<vmem>>, %arg3: memref<1x8xf32, #tpu.memory_space<vmem>>, %arg4: memref<1x8xf32, #tpu.memory_space<vmem>>, %arg5: memref<1x8x8x8xf32, #tpu.memory_space<vmem>>, %arg6: memref<1x8x8x8xf32, #tpu.memory_space<vmem>>) attributes {dimension_semantics = [#tpu.dimension_semantics<parallel>], iteration_bounds = array<i64: 2>, scalar_prefetch = 0 : i64, scratch_operands = 0 : i64, tpu.core_type = #tpu.core_type<tc>, window_params = [{transform_indices = @transform_0, window_bounds = array<i64: 1, 10, 10, 8>}, {pipeline_mode = #tpu.pipeline_mode<synchronous>, transform_indices = @transform_1, window_bounds = array<i64: 9, 8, 8>}, {pipeline_mode = #tpu.pipeline_mode<synchronous>, transform_indices = @transform_2, window_bounds = array<i64: 1, 8>}, {pipeline_mode = #tpu.pipeline_mode<synchronous>, transform_indices = @transform_3, window_bounds = array<i64: 1, 8>}, {transform_indices = @transform_4, window_bounds = array<i64: 1, 8, 8, 8>}, {transform_indices = @transform_5, window_bounds = array<i64: 1, 8, 8, 8>}]} {
    %c0 = arith.constant 0 : index
    %c0_0 = arith.constant 0 : index
    %c0_1 = arith.constant 0 : index
    %c0_2 = arith.constant 0 : index
    %0 = vector.load %arg1[%c0, %c0_0, %c0_1, %c0_2] : memref<1x10x10x8xf32, #tpu.memory_space<vmem>>, vector<1x10x10x8xf32>
    %1 = vector.shape_cast %0 : vector<1x10x10x8xf32> to vector<10x10x8xf32>
    %cst = arith.constant 0.000000e+00 : f32
    %2 = vector.broadcast %cst : f32 to vector<64x8xf32>
    %3 = vector.extract_strided_slice %1 {offsets = [0, 0, 0], sizes = [8, 8, 8], strides = [1, 1, 1]} : vector<10x10x8xf32> to vector<8x8x8xf32>
    %4 = vector.shape_cast %3 : vector<8x8x8xf32> to vector<64x8xf32>
    %c0_3 = arith.constant 0 : index
    %c0_4 = arith.constant 0 : index
    %c0_5 = arith.constant 0 : index
    %5 = vector.load %arg2[%c0_3, %c0_4, %c0_5] : memref<9x8x8xf32, #tpu.memory_space<vmem>>, vector<1x8x8xf32>
    %6 = vector.shape_cast %5 : vector<1x8x8xf32> to vector<8x8xf32>
    %cst_6 = arith.constant dense<0.000000e+00> : vector<64x8xf32>
    %7 = tpu.matmul %4, %6, %cst_6 {dimension_numbers = #tpu.dot_dimension_numbers<[1], [0], [0], [1], [0, 0, 1, 1], [], []>} : vector<64x8xf32>, vector<8x8xf32>, vector<64x8xf32> -> vector<64x8xf32>
    %8 = arith.addf %2, %7 : vector<64x8xf32>
    %9 = vector.extract_strided_slice %1 {offsets = [0, 1, 0], sizes = [8, 8, 8], strides = [1, 1, 1]} : vector<10x10x8xf32> to vector<8x8x8xf32>
    %10 = vector.shape_cast %9 : vector<8x8x8xf32> to vector<64x8xf32>
    %c1 = arith.constant 1 : index
    %c0_7 = arith.constant 0 : index
    %c0_8 = arith.constant 0 : index
    %11 = vector.load %arg2[%c1, %c0_7, %c0_8] : memref<9x8x8xf32, #tpu.memory_space<vmem>>, vector<1x8x8xf32>
    %12 = vector.shape_cast %11 : vector<1x8x8xf32> to vector<8x8xf32>
    %cst_9 = arith.constant dense<0.000000e+00> : vector<64x8xf32>
    %13 = tpu.matmul %10, %12, %cst_9 {dimension_numbers = #tpu.dot_dimension_numbers<[1], [0], [0], [1], [0, 0, 1, 1], [], []>} : vector<64x8xf32>, vector<8x8xf32>, vector<64x8xf32> -> vector<64x8xf32>
    %14 = arith.addf %8, %13 : vector<64x8xf32>
    %15 = vector.extract_strided_slice %1 {offsets = [0, 2, 0], sizes = [8, 8, 8], strides = [1, 1, 1]} : vector<10x10x8xf32> to vector<8x8x8xf32>
    %16 = vector.shape_cast %15 : vector<8x8x8xf32> to vector<64x8xf32>
    %c2 = arith.constant 2 : index
    %c0_10 = arith.constant 0 : index
    %c0_11 = arith.constant 0 : index
    %17 = vector.load %arg2[%c2, %c0_10, %c0_11] : memref<9x8x8xf32, #tpu.memory_space<vmem>>, vector<1x8x8xf32>
    %18 = vector.shape_cast %17 : vector<1x8x8xf32> to vector<8x8xf32>
    %cst_12 = arith.constant dense<0.000000e+00> : vector<64x8xf32>
    %19 = tpu.matmul %16, %18, %cst_12 {dimension_numbers = #tpu.dot_dimension_numbers<[1], [0], [0], [1], [0, 0, 1, 1], [], []>} : vector<64x8xf32>, vector<8x8xf32>, vector<64x8xf32> -> vector<64x8xf32>
    %20 = arith.addf %14, %19 : vector<64x8xf32>
    %21 = vector.extract_strided_slice %1 {offsets = [1, 0, 0], sizes = [8, 8, 8], strides = [1, 1, 1]} : vector<10x10x8xf32> to vector<8x8x8xf32>
    %22 = vector.shape_cast %21 : vector<8x8x8xf32> to vector<64x8xf32>
    %c3 = arith.constant 3 : index
    %c0_13 = arith.constant 0 : index
    %c0_14 = arith.constant 0 : index
    %23 = vector.load %arg2[%c3, %c0_13, %c0_14] : memref<9x8x8xf32, #tpu.memory_space<vmem>>, vector<1x8x8xf32>
    %24 = vector.shape_cast %23 : vector<1x8x8xf32> to vector<8x8xf32>
    %cst_15 = arith.constant dense<0.000000e+00> : vector<64x8xf32>
    %25 = tpu.matmul %22, %24, %cst_15 {dimension_numbers = #tpu.dot_dimension_numbers<[1], [0], [0], [1], [0, 0, 1, 1], [], []>} : vector<64x8xf32>, vector<8x8xf32>, vector<64x8xf32> -> vector<64x8xf32>
    %26 = arith.addf %20, %25 : vector<64x8xf32>
    %27 = vector.extract_strided_slice %1 {offsets = [1, 1, 0], sizes = [8, 8, 8], strides = [1, 1, 1]} : vector<10x10x8xf32> to vector<8x8x8xf32>
    %28 = vector.shape_cast %27 : vector<8x8x8xf32> to vector<64x8xf32>
    %c4 = arith.constant 4 : index
    %c0_16 = arith.constant 0 : index
    %c0_17 = arith.constant 0 : index
    %29 = vector.load %arg2[%c4, %c0_16, %c0_17] : memref<9x8x8xf32, #tpu.memory_space<vmem>>, vector<1x8x8xf32>
    %30 = vector.shape_cast %29 : vector<1x8x8xf32> to vector<8x8xf32>
    %cst_18 = arith.constant dense<0.000000e+00> : vector<64x8xf32>
    %31 = tpu.matmul %28, %30, %cst_18 {dimension_numbers = #tpu.dot_dimension_numbers<[1], [0], [0], [1], [0, 0, 1, 1], [], []>} : vector<64x8xf32>, vector<8x8xf32>, vector<64x8xf32> -> vector<64x8xf32>
    %32 = arith.addf %26, %31 : vector<64x8xf32>
    %33 = vector.extract_strided_slice %1 {offsets = [1, 2, 0], sizes = [8, 8, 8], strides = [1, 1, 1]} : vector<10x10x8xf32> to vector<8x8x8xf32>
    %34 = vector.shape_cast %33 : vector<8x8x8xf32> to vector<64x8xf32>
    %c5 = arith.constant 5 : index
    %c0_19 = arith.constant 0 : index
    %c0_20 = arith.constant 0 : index
    %35 = vector.load %arg2[%c5, %c0_19, %c0_20] : memref<9x8x8xf32, #tpu.memory_space<vmem>>, vector<1x8x8xf32>
    %36 = vector.shape_cast %35 : vector<1x8x8xf32> to vector<8x8xf32>
    %cst_21 = arith.constant dense<0.000000e+00> : vector<64x8xf32>
    %37 = tpu.matmul %34, %36, %cst_21 {dimension_numbers = #tpu.dot_dimension_numbers<[1], [0], [0], [1], [0, 0, 1, 1], [], []>} : vector<64x8xf32>, vector<8x8xf32>, vector<64x8xf32> -> vector<64x8xf32>
    %38 = arith.addf %32, %37 : vector<64x8xf32>
    %39 = vector.extract_strided_slice %1 {offsets = [2, 0, 0], sizes = [8, 8, 8], strides = [1, 1, 1]} : vector<10x10x8xf32> to vector<8x8x8xf32>
    %40 = vector.shape_cast %39 : vector<8x8x8xf32> to vector<64x8xf32>
    %c6 = arith.constant 6 : index
    %c0_22 = arith.constant 0 : index
    %c0_23 = arith.constant 0 : index
    %41 = vector.load %arg2[%c6, %c0_22, %c0_23] : memref<9x8x8xf32, #tpu.memory_space<vmem>>, vector<1x8x8xf32>
    %42 = vector.shape_cast %41 : vector<1x8x8xf32> to vector<8x8xf32>
    %cst_24 = arith.constant dense<0.000000e+00> : vector<64x8xf32>
    %43 = tpu.matmul %40, %42, %cst_24 {dimension_numbers = #tpu.dot_dimension_numbers<[1], [0], [0], [1], [0, 0, 1, 1], [], []>} : vector<64x8xf32>, vector<8x8xf32>, vector<64x8xf32> -> vector<64x8xf32>
    %44 = arith.addf %38, %43 : vector<64x8xf32>
    %45 = vector.extract_strided_slice %1 {offsets = [2, 1, 0], sizes = [8, 8, 8], strides = [1, 1, 1]} : vector<10x10x8xf32> to vector<8x8x8xf32>
    %46 = vector.shape_cast %45 : vector<8x8x8xf32> to vector<64x8xf32>
    %c7 = arith.constant 7 : index
    %c0_25 = arith.constant 0 : index
    %c0_26 = arith.constant 0 : index
    %47 = vector.load %arg2[%c7, %c0_25, %c0_26] : memref<9x8x8xf32, #tpu.memory_space<vmem>>, vector<1x8x8xf32>
    %48 = vector.shape_cast %47 : vector<1x8x8xf32> to vector<8x8xf32>
    %cst_27 = arith.constant dense<0.000000e+00> : vector<64x8xf32>
    %49 = tpu.matmul %46, %48, %cst_27 {dimension_numbers = #tpu.dot_dimension_numbers<[1], [0], [0], [1], [0, 0, 1, 1], [], []>} : vector<64x8xf32>, vector<8x8xf32>, vector<64x8xf32> -> vector<64x8xf32>
    %50 = arith.addf %44, %49 : vector<64x8xf32>
    %51 = vector.extract_strided_slice %1 {offsets = [2, 2, 0], sizes = [8, 8, 8], strides = [1, 1, 1]} : vector<10x10x8xf32> to vector<8x8x8xf32>
    %52 = vector.shape_cast %51 : vector<8x8x8xf32> to vector<64x8xf32>
    %c8 = arith.constant 8 : index
    %c0_28 = arith.constant 0 : index
    %c0_29 = arith.constant 0 : index
    %53 = vector.load %arg2[%c8, %c0_28, %c0_29] : memref<9x8x8xf32, #tpu.memory_space<vmem>>, vector<1x8x8xf32>
    %54 = vector.shape_cast %53 : vector<1x8x8xf32> to vector<8x8xf32>
    %cst_30 = arith.constant dense<0.000000e+00> : vector<64x8xf32>
    %55 = tpu.matmul %52, %54, %cst_30 {dimension_numbers = #tpu.dot_dimension_numbers<[1], [0], [0], [1], [0, 0, 1, 1], [], []>} : vector<64x8xf32>, vector<8x8xf32>, vector<64x8xf32> -> vector<64x8xf32>
    %56 = arith.addf %50, %55 : vector<64x8xf32>
    %c0_31 = arith.constant 0 : index
    %c0_32 = arith.constant 0 : index
    %57 = vector.load %arg3[%c0_31, %c0_32] : memref<1x8xf32, #tpu.memory_space<vmem>>, vector<1x8xf32>
    %58 = vector.broadcast %57 : vector<1x8xf32> to vector<64x8xf32>
    %59 = arith.mulf %56, %58 : vector<64x8xf32>
    %c0_33 = arith.constant 0 : index
    %c0_34 = arith.constant 0 : index
    %60 = vector.load %arg4[%c0_33, %c0_34] : memref<1x8xf32, #tpu.memory_space<vmem>>, vector<1x8xf32>
    %61 = vector.broadcast %60 : vector<1x8xf32> to vector<64x8xf32>
    %62 = arith.addf %59, %61 : vector<64x8xf32>
    %c0_35 = arith.constant 0 : index
    %c0_36 = arith.constant 0 : index
    %c0_37 = arith.constant 0 : index
    %c0_38 = arith.constant 0 : index
    %63 = vector.load %arg5[%c0_35, %c0_36, %c0_37, %c0_38] : memref<1x8x8x8xf32, #tpu.memory_space<vmem>>, vector<1x8x8x8xf32>
    %64 = vector.shape_cast %63 : vector<1x8x8x8xf32> to vector<8x8x8xf32>
    %65 = vector.shape_cast %64 : vector<8x8x8xf32> to vector<64x8xf32>
    %66 = arith.addf %62, %65 : vector<64x8xf32>
    %cst_39 = arith.constant 0.000000e+00 : f32
    %67 = vector.broadcast %cst_39 : f32 to vector<64x8xf32>
    %68 = arith.maximumf %66, %67 : vector<64x8xf32>
    %69 = vector.shape_cast %68 : vector<64x8xf32> to vector<8x8x8xf32>
    %c0_40 = arith.constant 0 : index
    %c0_41 = arith.constant 0 : index
    %c0_42 = arith.constant 0 : index
    %c0_43 = arith.constant 0 : index
    %70 = vector.load %arg6[%c0_40, %c0_41, %c0_42, %c0_43] : memref<1x8x8x8xf32, #tpu.memory_space<vmem>>, vector<1x8x8x8xf32>
    %71 = vector.shape_cast %70 : vector<1x8x8x8xf32> to vector<8x8x8xf32>
    %72 = vector.shape_cast %69 : vector<8x8x8xf32> to vector<1x8x8x8xf32>
    tpu.vector_store %arg6[%c0_40, %c0_41, %c0_42, %c0_43], %72 {strides = array<i32>} : memref<1x8x8x8xf32, #tpu.memory_space<vmem>>, vector<1x8x8x8xf32>,
    return
  }
  func.func @transform_0(%arg0: i32) -> (i32, i32, i32, i32) {
    %c0_i32 = arith.constant 0 : i32
    %c0_i32_0 = arith.constant 0 : i32
    %c0_i32_1 = arith.constant 0 : i32
    %c0_i32_2 = arith.constant 0 : i32
    return %arg0, %c0_i32, %c0_i32_0, %c0_i32_1 : i32, i32, i32, i32
  }
  func.func @transform_1(%arg0: i32) -> (i32, i32, i32) {
    %c0_i32 = arith.constant 0 : i32
    %c0_i32_0 = arith.constant 0 : i32
    %c0_i32_1 = arith.constant 0 : i32
    %c0_i32_2 = arith.constant 0 : i32
    return %c0_i32, %c0_i32_0, %c0_i32_1 : i32, i32, i32
  }
  func.func @transform_2(%arg0: i32) -> (i32, i32) {
    %c0_i32 = arith.constant 0 : i32
    %c0_i32_0 = arith.constant 0 : i32
    %c0_i32_1 = arith.constant 0 : i32
    return %c0_i32, %c0_i32_0 : i32, i32
  }
  func.func @transform_3(%arg0: i32) -> (i32, i32) {
    %c0_i32 = arith.constant 0 : i32
    %c0_i32_0 = arith.constant 0 : i32
    %c0_i32_1 = arith.constant 0 : i32
    return %c0_i32, %c0_i32_0 : i32, i32
  }
  func.func @transform_4(%arg0: i32) -> (i32, i32, i32, i32) {
    %c0_i32 = arith.constant 0 : i32
    %c0_i32_0 = arith.constant 0 : i32
    %c0_i32_1 = arith.constant 0 : i32
    %c0_i32_2 = arith.constant 0 : i32
    return %arg0, %c0_i32, %c0_i32_0, %c0_i32_1 : i32, i32, i32, i32
  }
  func.func @transform_5(%arg0: i32) -> (i32, i32, i32, i32) {
    %c0_i32 = arith.constant 0 : i32
    %c0_i32_0 = arith.constant 0 : i32
    %c0_i32_1 = arith.constant 0 : i32
    %c0_i32_2 = arith.constant 0 : i32
    return %arg0, %c0_i32, %c0_i32_0, %c0_i32_1 : i32, i32, i32, i32
  }
}

</mosaic_0001>

<bundles_post_ra>
// kernel: residual_block_2_forward.3
= control target key start
LH: loop header
LB: loop body
LE: loop exit
PB: predicated region body
PF: predicated region fallthrough
CT: control target
= control target key end

     0   :  { %s1971_s18 = smov 0   ;;  %s2311_s0 = inlined_call_operand.vmem [shape: f32[2,10,10,8], index: 0, kind: input, shape index: {}]   ;;  %s2312_s1 = inlined_call_operand.vmem [shape: f32[9,8,8], index: 1, kind: input, shape index: {}]   ;;  %s2313_s2 = inlined_call_operand.vmem [shape: f32[1,8], index: 2, kind: input, shape index: {}]   ;;  %s2314_s3 = inlined_call_operand.vmem [shape: f32[1,8], index: 3, kind: input, shape index: {}]   ;;  %s2315_s4 = inlined_call_operand.vmem [shape: f32[2,8,8,8], index: 4, kind: input, shape index: {}]   ;;  %s2316_s5 = inlined_call_operand.vmem [shape: f32[2,8,8,8], index: 5, kind: output, shape index: {}]  }
   0x1 LB: > { %s1555_s19 = sadd.s32 4294967295, %s1939_s18   ;;  %p1559_p0 = scmp.ge.s32.totalorder %s1939_s18, 1  ;;  %s1939_s18 = sphi %s1971_s18, %s15_s18  }
   0x2   : > { %p197_p1 = scmp.lt.s32.totalorder %s1939_s18, 3 }
   0x4   : > { %p198_p2 = pnand %p1559_p0, %p197_p1 }
   0x5   : > { %v1565_v0 = vld [vmem:[%s2312_s1 + $0x8] sm:$0xff] (!%p198_p2)  ;;  %v1985_v1 = vld [vmem:[%s2312_s1 + $0x20] sm:$0xff] (!%p198_p2)  ;;  %p230_p3 = scmp.lt.s32.totalorder (!%p198_p2), %s1555_s19, 1  ;;  %vm282_vm0 = vcmask (!%p198_p2), 1046528   ;;  %vm309_vm1 = vcmask (!%p198_p2), 64512   ;;  %vm552_vm2 = vcmask (!%p198_p2), 1045504  }
   0x6   : > { %201 = sbr.rel (%p198_p2) target bundleno = 315 (0x13b), region = 40  ;;  %v265_v2 = vld [vmem:[%s2312_s1] sm:$0xff] (!%p198_p2)  ;;  %1732 = vmatprep.subr.mxu1 (!%p198_p2), %v1565_v0  ;;  %1788 = vmatprep.subr.mxu0 (!%p198_p2), %v1985_v1  ;;  %v1609_v3 = vld [vmem:[%s2312_s1 + $0x28] sm:$0xff] (!%p198_p2)  ;;  %v1618_v30 = vld [vmem:[%s2312_s1 + $0x30] sm:$0xff] (!%p198_p2) }
   0x7   : > { %1733 = vmatpush3.msra.mxu1 (!%p198_p2), %v1565_v0  ;;  %1789 = vmatpush3.msra.mxu0 (!%p198_p2), %v1985_v1  ;;  %v1582_v38 = vld [vmem:[%s2312_s1 + $0x10] sm:$0xff] (!%p198_p2)  ;;  %v1627_v58 = vld [vmem:[%s2312_s1 + $0x38] sm:$0xff] (!%p198_p2) }
   0x8   : > { %1746 = vmatprep.subr.mxu1 (!%p198_p2), %v265_v2  ;;  %1802 = vmatprep.subr.mxu0 (!%p198_p2), %v1609_v3 }
   0xd   : > { %s2318_s19 = smov (!%p230_p3, %s1555_s19), 1 }
   0xe   : > { %s1924_s28 = smul.u32 160, %s2318_s19  ;;  %s1649_s17 = sshll.u32 %s2318_s19, 6 }
   0xf   : > { %s2274_s24 = scalar_lea.vmem %s2315_s4, %s1649_s17 }
  0x10   : > { %s2001_s6 = scalar_lea.vmem %s2311_s0, %s1924_s28  ;;  %s2284_s28 = scalar_lea.vmem %s2316_s5, %s1649_s17 }
  0x11   : > { %v2004_v4 = vld [vmem:[%s2001_s6] sm:$0xff]  ;;  %v2007_v5 = vld [vmem:[%s2001_s6 + $0x8] sm:$0x3]  ;;  %v2010_v6 = vld [vmem:[%s2001_s6 + $0x10] sm:$0xff] }
  0x12   : > { %v283_v7 = vrot.slane %v2004_v4, 1  ;;  %v284_v8 = vrot.slane %v2007_v5, 1  ;;  %v248_v9 = vld [vmem:[%s2001_s6 + $0x18] sm:$0x3]  ;;  %v286_v10 = vrot.slane %v2010_v6, 1  ;;  %v2017_v12 = vld [vmem:[%s2001_s6 + $0x20] sm:$0xff] }
  0x13   : > { %v287_v11 = vrot.slane %v248_v9, 1  ;;  %v250_v13 = vld [vmem:[%s2001_s6 + $0x28] sm:$0x3]  ;;  %v2021_v14 = vld [vmem:[%s2001_s6 + $0x30] sm:$0xff]  ;;  %v557_v16 = vrot.slane %v248_v9, 2  ;;  %v289_v17 = vrot.slane %v2017_v12, 1 }
  0x14   : > { %v285_v15 = vsel %vm282_vm0, %v283_v7, %v284_v8  ;;  %v290_v18 = vrot.slane %v250_v13, 1  ;;  %v252_v19 = vld [vmem:[%s2001_s6 + $0x38] sm:$0x3]  ;;  %v2027_v20 = vld [vmem:[%s2001_s6 + $0x40] sm:$0xff]  ;;  %v292_v22 = vrot.slane %v2021_v14, 1  ;;  %v2035_v26 = vld [vmem:[%s2001_s6 + $0x50] sm:$0xff] }
  0x15   : > { %1734 = vmatprep.mubr.msk.f32.mxu1 %vm309_vm1, %v285_v15  ;;  %v288_v21 = vsel %vm282_vm0, %v286_v10, %v287_v11  ;;  %v293_v23 = vrot.slane %v252_v19, 1  ;;  %v254_v24 = vld [vmem:[%s2001_s6 + $0x48] sm:$0x3]  ;;  %v295_v25 = vrot.slane %v2027_v20, 1  ;;  %v556_v29 = vrot.slane %v2010_v6, 2  ;;  %v2048_v32 = vld [vmem:[%s2001_s6 + $0x60] sm:$0xff] }
  0x16   : > { %1790 = vmatprep.mubr.msk.f32.mxu0 %vm309_vm1, %v288_v21  ;;  %1735 = vmatmul.mubr.msk.f32.vlgmr.msra.gmra.mrb[0].mxu1 %vm309_vm1, %v288_v21  ;;  %v2040_v27 = vsel %vm282_vm0, %v289_v17, %v290_v18  ;;  %v296_v28 = vrot.slane %v254_v24, 1  ;;  %v256_v31 = vld [vmem:[%s2001_s6 + $0x58] sm:$0x3]  ;;  %v560_v33 = vrot.slane %v250_v13, 2  ;;  %v298_v35 = vrot.slane %v2035_v26, 1  ;;  %v2068_v43 = vld [vmem:[%s2001_s6 + $0x70] sm:$0xff] }
  0x17   : > { %1747 = vmatpush3.msra.mxu1 %v265_v2  ;;  %1791 = vmatmul.mubr.msk.f32.vlgmr.msra.gmra.mrb[0].mxu0 %vm309_vm1, %v2040_v27  ;;  %v2053_v34 = vsel %vm282_vm0, %v292_v22, %v293_v23  ;;  %v299_v36 = vrot.slane %v256_v31, 1  ;;  %v258_v37 = vld [vmem:[%s2001_s6 + $0x68] sm:$0x3]  ;;  %v559_v40 = vrot.slane %v2017_v12, 2  ;;  %v301_v41 = vrot.slane %v2048_v32, 1  ;;  %v1591_v13 = vld [vmem:[%s2312_s1 + $0x18] sm:$0xff] }
  0x18   : > { %1803 = vmatpush3.msra.mxu0 %v1609_v3  ;;  %1737 = vmatprep.mubr.msk.f32.mxu1 %vm309_vm1, %v2040_v27  ;;  %v2063_v39 = vsel %vm282_vm0, %v295_v25, %v296_v28  ;;  %v302_v42 = vrot.slane %v258_v37, 1  ;;  %v260_v44 = vld [vmem:[%s2001_s6 + $0x78] sm:$0x3]  ;;  %v2074_v45 = vsel %vm552_vm2, %v556_v29, %v557_v16  ;;  %v562_v46 = vrot.slane %v2021_v14, 2  ;;  %v2123_v3 = vld [vmem:[%s2001_s6 + $0x80] sm:$0xff] }
  0x19   : > { %1793 = vmatprep.mubr.msk.f32.mxu0 %vm309_vm1, %v2053_v34  ;;  %1816 = vmatprep.subr.mxu0 %v1618_v30  ;;  %v563_v47 = vrot.slane %v252_v19, 2  ;;  %v2084_v48 = vsel %vm282_vm0, %v298_v35, %v299_v36  ;;  %v304_v49 = vrot.slane %v2068_v43, 1  ;;  %v305_v50 = vrot.slane %v260_v44, 1  ;;  %v2126_v7 = vld [vmem:[%s2001_s6 + $0x88] sm:$0x3]  ;;  %v1636_v18 = vld [vmem:[%s2312_s1 + $0x40] sm:$0xff] }
  0x1a   : > { %1738 = vmatmul.mubr.msk.f32.gmra.mrb[2].mxu1 %vm309_vm1, %v2053_v34  ;;  %1760 = vmatprep.subr.mxu1 %v1582_v38  ;;  %v2090_v51 = vsel %vm552_vm2, %v559_v40, %v560_v33  ;;  %v2093_v52 = vsel %vm282_vm0, %v301_v41, %v302_v42  ;;  %v565_v53 = vrot.slane %v2027_v20, 2  ;;  %v566_v54 = vrot.slane %v254_v24, 2  ;;  %v264_v22 = vld [vmem:[%s2001_s6 + $0x98] sm:$0x3]  ;;  %v1646_v33 = vld [vmem:[%s2314_s3] ss:$0 sm:$0xff] }
  0x1b   : > { %1794 = vmatmul.mubr.msk.f32.gmra.mrb[2].mxu0 %vm309_vm1, %v2063_v39  ;;  %1740 = vmatprep.mubr.msk.f32.mxu1 %vm309_vm1, %v2063_v39  ;;  %v2097_v55 = vsel %vm552_vm2, %v562_v46, %v563_v47  ;;  %v568_v56 = vrot.slane %v2035_v26, 2  ;;  %v569_v57 = vrot.slane %v256_v31, 2  ;;  %v2110_v59 = vsel %vm282_vm0, %v304_v49, %v305_v50  ;;  %v1457_v36 = vld [vmem:[%s2274_s24 + $0x8] sm:$0xff]  ;;  %v1456_v40 = vld [vmem:[%s2274_s24] sm:$0xff]  ;;  %v1459_v49 = vld [vmem:[%s2274_s24 + $0x18] sm:$0xff] }
  0x1c   : > { %1804 = vmatprep.mubr.msk.f32.mxu0 %vm309_vm1, %v2074_v45  ;;  %v2115_v60 = vsel %vm552_vm2, %v565_v53, %v566_v54  ;;  %v571_v61 = vrot.slane %v2048_v32, 2  ;;  %v572_v62 = vrot.slane %v258_v37, 2  ;;  %v574_v0 = vrot.slane %v2068_v43, 2 }
  0x1d   : > { %v2119_v63 = vsel %vm552_vm2, %v568_v56, %v569_v57  ;;  %v575_v2 = vrot.slane %v260_v44, 2  ;;  %v947_v9 = vrot.slane %v2123_v3, 2  ;;  %v948_v10 = vrot.slane %v2126_v7, 2 }
  0x1e   : > { %1741 = vmatmul.mubr.msk.f32.gmra.mrb[4].mxu1 %vm309_vm1, %v2084_v48  ;;  %v2137_v8 = vsel %vm552_vm2, %v571_v61, %v572_v62  ;;  %v554_v16 = vrot.slane %v2007_v5, 2  ;;  %v553_v17 = vrot.slane %v2004_v4, 2  ;;  %v263_v5 = vld [vmem:[%s2001_s6 + $0x90] sm:$0xff]  ;;  %v827_v19 = vrot.slane %v2123_v3, 1 }
  0x1f   : > { %1805 = vmatmul.mubr.msk.f32.vlgmr.msra.gmra.mrb[0].mxu0 %vm309_vm1, %v2090_v51  ;;  %1743 = vmatprep.mubr.msk.f32.mxu1 %vm309_vm1, %v2093_v52  ;;  %v2142_v11 = vsel %vm552_vm2, %v574_v0, %v575_v2  ;;  %v2156_v15 = vsel %vm552_vm2, %v947_v9, %v948_v10  ;;  %v828_v21 = vrot.slane %v2126_v7, 1  ;;  %v1186_v23 = vrot.slane %v263_v5, 1  ;;  %v1461_v2 = vld [vmem:[%s2274_s24 + $0x28] sm:$0xff] }
  0x20   : > { %1817 = vmatpush3.msra.mxu0 %v1618_v30  ;;  %1807 = vmatprep.mubr.msk.f32.mxu0 %vm309_vm1, %v2097_v55  ;;  %v1187_v24 = vrot.slane %v264_v22, 1  ;;  %v1645_v30 = vld [vmem:[%s2313_s2] ss:$0 sm:$0xff] }
  0x21   : > { %1830 = vmatprep.subr.mxu0 %v1627_v58  ;;  %v829_v25 = vsel %vm282_vm0, %v827_v19, %v828_v21  ;;  %v1463_v21 = vld [vmem:[%s2274_s24 + $0x38] sm:$0xff] }
  0x22   : > { %1744 = vmatmul.mubr.msk.f32.gmra.mrb[6].mxu1 %vm309_vm1, %v2110_v59 }
  0x23   : > { %1808 = vmatmul.mubr.msk.f32.gmra.mrb[2].mxu0 %vm309_vm1, %v2115_v60  ;;  %1748 = vmatprep.mubr.msk.f32.mxu1 %vm309_vm1, %v2004_v4  ;;  %v555_v4 = vsel %vm552_vm2, %v553_v17, %v554_v16 }
  0x24   : > { %1810 = vmatprep.mubr.msk.f32.mxu0 %vm309_vm1, %v2119_v63 }
  0x26   : > { %1749 = vmatmul.mubr.msk.f32.vlgmr.msra.gmra.mrb[0].mxu1 %vm309_vm1, %v2010_v6 }
  0x27   : > { %1761 = vmatpush3.msra.mxu1 %v1582_v38  ;;  %1811 = vmatmul.mubr.msk.f32.gmra.mrb[4].mxu0 %vm309_vm1, %v2137_v8 }
  0x28   : > { %1751 = vmatprep.mubr.msk.f32.mxu1 %vm309_vm1, %v2017_v12  ;;  %1813 = vmatprep.mubr.msk.f32.mxu0 %vm309_vm1, %v2142_v11 }
  0x29   : > { %1774 = vmatprep.subr.mxu1 %v1591_v13 }
  0x2a   : > { %1752 = vmatmul.mubr.msk.f32.gmra.mrb[2].mxu1 %vm309_vm1, %v2021_v14 }
  0x2b   : > { %1814 = vmatmul.mubr.msk.f32.gmra.mrb[6].mxu0 %vm309_vm1, %v2156_v15  ;;  %1754 = vmatprep.mubr.msk.f32.mxu1 %vm309_vm1, %v2027_v20 }
  0x2c   : > { %1818 = vmatprep.mubr.msk.f32.mxu0 %vm309_vm1, %v2017_v12 }
  0x2e   : > { %1755 = vmatmul.mubr.msk.f32.gmra.mrb[4].mxu1 %vm309_vm1, %v2035_v26 }
  0x2f   : > { %1819 = vmatmul.mubr.msk.f32.vlgmr.msra.gmra.mrb[0].mxu0 %vm309_vm1, %v2021_v14  ;;  %1757 = vmatprep.mubr.msk.f32.mxu1 %vm309_vm1, %v2048_v32 }
  0x30   : > { %1831 = vmatpush3.msra.mxu0 %v1627_v58  ;;  %1821 = vmatprep.mubr.msk.f32.mxu0 %vm309_vm1, %v2027_v20 }
  0x31   : > { %1844 = vmatprep.subr.mxu0 %v1636_v18 }
  0x32   : > { %1758 = vmatmul.mubr.msk.f32.gmra.mrb[6].mxu1 %vm309_vm1, %v2068_v43 }
  0x33   : > { %1822 = vmatmul.mubr.msk.f32.gmra.mrb[2].mxu0 %vm309_vm1, %v2035_v26  ;;  %1762 = vmatprep.mubr.msk.f32.mxu1 %vm309_vm1, %v555_v4 }
  0x34   : > { %1824 = vmatprep.mubr.msk.f32.mxu0 %vm309_vm1, %v2048_v32 }
  0x36   : > { %1763 = vmatmul.mubr.msk.f32.vlgmr.msra.gmra.mrb[0].mxu1 %vm309_vm1, %v2074_v45 }
  0x37   : > { %1775 = vmatpush3.msra.mxu1 %v1591_v13  ;;  %1825 = vmatmul.mubr.msk.f32.gmra.mrb[4].mxu0 %vm309_vm1, %v2068_v43 }
  0x38   : > { %1765 = vmatprep.mubr.msk.f32.mxu1 %vm309_vm1, %v2090_v51  ;;  %1827 = vmatprep.mubr.msk.f32.mxu0 %vm309_vm1, %v2123_v3 }
  0x39   : > { %1858 = vmatprep.subr.mxu1 %v1985_v1 }
  0x3a   : > { %1766 = vmatmul.mubr.msk.f32.gmra.mrb[2].mxu1 %vm309_vm1, %v2097_v55 }
  0x3b   : > { %1828 = vmatmul.mubr.msk.f32.gmra.mrb[6].mxu0 %vm309_vm1, %v263_v5  ;;  %1768 = vmatprep.mubr.msk.f32.mxu1 %vm309_vm1, %v2115_v60 }
  0x3c   : > { %1832 = vmatprep.mubr.msk.f32.mxu0 %vm309_vm1, %v2040_v27 }
  0x3e   : > { %1769 = vmatmul.mubr.msk.f32.gmra.mrb[4].mxu1 %vm309_vm1, %v2119_v63 }
  0x3f   : > { %1833 = vmatmul.mubr.msk.f32.vlgmr.msra.gmra.mrb[0].mxu0 %vm309_vm1, %v2053_v34  ;;  %1771 = vmatprep.mubr.msk.f32.mxu1 %vm309_vm1, %v2137_v8 }
  0x40   : > { %1845 = vmatpush3.msra.mxu0 %v1636_v18  ;;  %1835 = vmatprep.mubr.msk.f32.mxu0 %vm309_vm1, %v2063_v39 }
  0x42   : > { %1772 = vmatmul.mubr.msk.f32.gmra.mrb[6].mxu1 %vm309_vm1, %v2142_v11 }
  0x43   : > { %1836 = vmatmul.mubr.msk.f32.gmra.mrb[2].mxu0 %vm309_vm1, %v2084_v48  ;;  %1776 = vmatprep.mubr.msk.f32.mxu1 %vm309_vm1, %v2010_v6  ;;  %v1188_v6 = vsel %vm282_vm0, %v1186_v23, %v1187_v24 }
  0x44   : > { %1838 = vmatprep.mubr.msk.f32.mxu0 %vm309_vm1, %v2093_v52 }
  0x46   : > { %1777 = vmatmul.mubr.msk.f32.vlgmr.msra.gmra.mrb[0].mxu1 %vm309_vm1, %v2017_v12  ;;  %v1307_v12 = vrot.slane %v264_v22, 2 }
  0x47   : > { %1859 = vmatpush3.msra.mxu1 %v1985_v1  ;;  %1839 = vmatmul.mubr.msk.f32.gmra.mrb[4].mxu0 %vm309_vm1, %v2110_v59  ;;  %v1306_v1 = vrot.slane %v263_v5, 2 }
  0x48   : > { %1779 = vmatprep.mubr.msk.f32.mxu1 %vm309_vm1, %v2021_v14  ;;  %1841 = vmatprep.mubr.msk.f32.mxu0 %vm309_vm1, %v829_v25 }
  0x49   : > { %v1308_v14 = vsel %vm552_vm2, %v1306_v1, %v1307_v12 }
  0x4a   : > { %1780 = vmatmul.mubr.msk.f32.gmra.mrb[2].mxu1 %vm309_vm1, %v2027_v20 }
  0x4b   : > { %1842 = vmatmul.mubr.msk.f32.gmra.mrb[6].mxu0 %vm309_vm1, %v1188_v6  ;;  %1782 = vmatprep.mubr.msk.f32.mxu1 %vm309_vm1, %v2035_v26 }
  0x4c   : > { %1846 = vmatprep.mubr.msk.f32.mxu0 %vm309_vm1, %v2090_v51 }
  0x4e   : > { %1783 = vmatmul.mubr.msk.f32.gmra.mrb[4].mxu1 %vm309_vm1, %v2048_v32 }
  0x4f   : > { %1847 = vmatmul.mubr.msk.f32.vlgmr.msra.gmra.mrb[0].mxu0 %vm309_vm1, %v2097_v55  ;;  %1785 = vmatprep.mubr.msk.f32.mxu1 %vm309_vm1, %v2068_v43  ;;  %v1458_v55 = vld [vmem:[%s2274_s24 + $0x10] sm:$0xff] }
  0x50   : > { %1849 = vmatprep.mubr.msk.f32.mxu0 %vm309_vm1, %v2115_v60 }
  0x52   : > { %1786 = vmatmul.mubr.msk.f32.gmra.mrb[6].mxu1 %vm309_vm1, %v2123_v3 }
  0x53   : > { %1850 = vmatmul.mubr.msk.f32.gmra.mrb[2].mxu0 %vm309_vm1, %v2119_v63  ;;  %1796 = vmatprep.mubr.msk.f32.mxu1 %vm309_vm1, %v2084_v48 }
  0x54   : > { %1852 = vmatprep.mubr.msk.f32.mxu0 %vm309_vm1, %v2137_v8 }
  0x56   : > { %1797 = vmatmul.mubr.msk.f32.vlgmr.msra.gmra.mrb[4].mxu1 %vm309_vm1, %v2093_v52 }
  0x57   : > { %1853 = vmatmul.mubr.msk.f32.gmra.mrb[4].mxu0 %vm309_vm1, %v2142_v11  ;;  %1799 = vmatprep.mubr.msk.f32.mxu1 %vm309_vm1, %v2110_v59  ;;  %v1460_v11 = vld [vmem:[%s2274_s24 + $0x20] sm:$0xff] }
  0x58   : > { %1855 = vmatprep.mubr.msk.f32.mxu0 %vm309_vm1, %v2156_v15 }
  0x5a   : > { %1800 = vmatmul.mubr.msk.f32.gmra.mrb[6].mxu1 %vm309_vm1, %v829_v25  ;;  %v1462_v25 = vld [vmem:[%s2274_s24 + $0x30] sm:$0xff] }
  0x5b   : > { %1856 = vmatmul.mubr.msk.f32.gmra.mrb[6].mxu0 %vm309_vm1, %v1308_v14 }
 0x119   : > { %v1778_v20 = vpop.f32.mrb[0].mxu1 }
 0x11a   : > { %v779_v26 = vpop.f32.mrb[1].mxu1 }
 0x11d   : > { %v1781_v27 = vpop.f32.mrb[2].mxu1 }
 0x11e   : > { %v789_v28 = vpop.f32.mrb[3].mxu1 }
 0x122   : > { %v1848_v29 = vpop.f32.mrb[0].mxu0 }
 0x123   : > { %v1860_v31 = vadd.f32 %v1848_v29, %v1778_v20  ;;  %v1379_v32 = vpop.f32.mrb[1].mxu0 }
 0x124   : > { %v1861_v34 = vadd.f32 %v1379_v32, %v779_v26 }
 0x125   : > { %v1434_v35 = vmul.f32 %v1860_v31, %v1645_v30 }
 0x126   : > { %v1433_v37 = vmul.f32 %v1861_v34, %v1645_v30  ;;  %v1851_v38 = vpop.f32.mrb[2].mxu0 }
 0x127   : > { %v1449_v39 = vadd.f32 %v1646_v33, %v1434_v35  ;;  %v1862_v41 = vadd.f32 %v1851_v38, %v1781_v27  ;;  %v1389_v42 = vpop.f32.mrb[3].mxu0 }
 0x128   : > { %v1448_v43 = vadd.f32 %v1646_v33, %v1433_v37  ;;  %v1863_v44 = vadd.f32 %v1389_v42, %v789_v28 }
 0x129   : > { %v1465_v45 = vadd.f32 %v1457_v36, %v1449_v39  ;;  %v1436_v46 = vmul.f32 %v1862_v41, %v1645_v30  ;;  %v1798_v47 = vpop.f32.mrb[4].mxu1 }
 0x12a   : > { %v1464_v48 = vadd.f32 %v1456_v40, %v1448_v43  ;;  %v1435_v50 = vmul.f32 %v1863_v44, %v1645_v30  ;;  %v1854_v51 = vpop.f32.mrb[4].mxu0  ;;  %v920_v52 = vpop.f32.mrb[5].mxu1 }
 0x12b   : > { %v1473_v53 = vmax.f32 %v1465_v45, 0.0  ;;  %v1451_v54 = vadd.f32 %v1646_v33, %v1436_v46  ;;  %v1864_v56 = vadd.f32 %v1854_v51, %v1798_v47  ;;  %v1399_v57 = vpop.f32.mrb[5].mxu0 }
 0x12c   : > { %v1472_v58 = vmax.f32 %v1464_v48, 0.0  ;;  %v1450_v59 = vadd.f32 %v1646_v33, %v1435_v50  ;;  %v1865_v60 = vadd.f32 %v1399_v57, %v920_v52 }
 0x12d   : > { %1481 = vst.msk [vmem:[%s2284_s28 + $0x8] sm:$0xff] %vm309_vm1, %v1473_v53  ;;  %v1467_v61 = vadd.f32 %v1459_v49, %v1451_v54  ;;  %v1438_v62 = vmul.f32 %v1864_v56, %v1645_v30  ;;  %v1801_v63 = vpop.f32.mrb[6].mxu1 }
 0x12e   : > { %1480 = vst.msk [vmem:[%s2284_s28] sm:$0xff] %vm309_vm1, %v1472_v58  ;;  %v1466_v0 = vadd.f32 %v1458_v55, %v1450_v59  ;;  %v1437_v3 = vmul.f32 %v1865_v60, %v1645_v30  ;;  %v1857_v7 = vpop.f32.mrb[6].mxu0  ;;  %v930_v8 = vpop.f32.mrb[7].mxu1 }
 0x12f   : > { %v1475_v9 = vmax.f32 %v1467_v61, 0.0  ;;  %v1453_v10 = vadd.f32 %v1646_v33, %v1438_v62  ;;  %v1866_v13 = vadd.f32 %v1857_v7, %v1801_v63  ;;  %v1409_v15 = vpop.f32.mrb[7].mxu0 }
 0x130   : > { %v1474_v16 = vmax.f32 %v1466_v0, 0.0  ;;  %v1452_v17 = vadd.f32 %v1646_v33, %v1437_v3  ;;  %v1867_v18 = vadd.f32 %v1409_v15, %v930_v8 }
 0x131   : > { %1483 = vst.msk [vmem:[%s2284_s28 + $0x18] sm:$0xff] %vm309_vm1, %v1475_v9  ;;  %v1469_v4 = vadd.f32 %v1461_v2, %v1453_v10  ;;  %v1440_v5 = vmul.f32 %v1866_v13, %v1645_v30 }
 0x132   : > { %1482 = vst.msk [vmem:[%s2284_s28 + $0x10] sm:$0xff] %vm309_vm1, %v1474_v16  ;;  %v1468_v19 = vadd.f32 %v1460_v11, %v1452_v17  ;;  %v1439_v22 = vmul.f32 %v1867_v18, %v1645_v30 }
 0x133   : > { %v1477_v23 = vmax.f32 %v1469_v4, 0.0  ;;  %v1455_v24 = vadd.f32 %v1646_v33, %v1440_v5 }
 0x134   : > { %v1476_v6 = vmax.f32 %v1468_v19, 0.0  ;;  %v1454_v1 = vadd.f32 %v1646_v33, %v1439_v22 }
 0x135   : > { %1485 = vst.msk [vmem:[%s2284_s28 + $0x28] sm:$0xff] %vm309_vm1, %v1477_v23  ;;  %v1471_v12 = vadd.f32 %v1463_v21, %v1455_v24 }
 0x136   : > { %1484 = vst.msk [vmem:[%s2284_s28 + $0x20] sm:$0xff] %vm309_vm1, %v1476_v6  ;;  %v1470_v14 = vadd.f32 %v1462_v25, %v1454_v1 }
 0x137   : > { %v1479_v20 = vmax.f32 %v1471_v12, 0.0 }
 0x138   : > { %v1478_v26 = vmax.f32 %v1470_v14, 0.0 }
 0x139   : > { %1487 = vst.msk [vmem:[%s2284_s28 + $0x38] sm:$0xff] %vm309_vm1, %v1479_v20 }
 0x13a   : > { %1486 = vst.msk [vmem:[%s2284_s28 + $0x30] sm:$0xff] %vm309_vm1, %v1478_v26 }
 0x13b PF: > { %s15_s18 = sadd.s32 1, %s1939_s18  }
 0x13c   : > { %p12_p4 = scmp.ge.s32.totalorder %s15_s18, 4  }
 0x13e   :  { %14 = sbr.rel (!%p12_p4) target bundleno = 1 (0x1), region = 81 }

// kernel: residual_block_2_forward.2
= control target key start
LH: loop header
LB: loop body
LE: loop exit
PB: predicated region body
PF: predicated region fallthrough
CT: control target
= control target key end

     0   :  { %s2443_s27 = smov 0   ;;  %s2934_s0 = inlined_call_operand.vmem [shape: f32[2,4,9,9,4], index: 0, kind: input, shape index: {}]   ;;  %s2935_s1 = inlined_call_operand.vmem [shape: f32[9,4,8], index: 1, kind: input, shape index: {}]   ;;  %s2936_s2 = inlined_call_operand.vmem [shape: f32[1,8], index: 2, kind: input, shape index: {}]   ;;  %s2937_s3 = inlined_call_operand.vmem [shape: f32[1,8], index: 3, kind: input, shape index: {}]   ;;  %s2938_s4 = inlined_call_operand.vmem [shape: f32[4,8], index: 4, kind: input, shape index: {}]   ;;  %s2939_s5 = inlined_call_operand.vmem [shape: f32[1,8], index: 5, kind: input, shape index: {}]   ;;  %s2940_s6 = inlined_call_operand.vmem [shape: f32[1,8], index: 6, kind: input, shape index: {}]   ;;  %s2941_s7 = inlined_call_operand.vmem [shape: f32[2,10,10,8], index: 7, kind: output, shape index: {0}]   ;;  %s2942_s8 = inlined_call_operand.vmem [shape: f32[2,8,8,8], index: 8, kind: output, shape index: {1}]  }
   0x1 LB: > { %s1929_s28 = sadd.s32 4294967295, %s2395_s27   ;;  %p1933_p0 = scmp.ge.s32.totalorder %s2395_s27, 1  ;;  %s2395_s27 = sphi %s2443_s27, %s19_s27  }
   0x2   : > { %p265_p1 = scmp.lt.s32.totalorder %s2395_s27, 3 }
   0x4   : > { %p266_p2 = pnand %p1933_p0, %p265_p1 }
   0x5   : > { %vm401_vm0 = vcmask (!%p266_p2), 1043456   ;;  %v2010_v0 = vld [vmem:[%s2935_s1 + $0x10] sm:$0xf] (!%p266_p2)  ;;  %v1971_v1 = vld [vmem:[%s2935_s1 + $0x4] sm:$0xf] (!%p266_p2)  ;;  %p304_p3 = scmp.lt.s32.totalorder (!%p266_p2), %s1929_s28, 1 }
   0x6   : > { %269 = sbr.rel (%p266_p2) target bundleno = 318 (0x13e), region = 48  ;;  %2230 = vmatprep.subr.msk.mxu0 (!%p266_p2), %vm401_vm0, %v2010_v0  ;;  %2174 = vmatprep.subr.msk.mxu1 (!%p266_p2), %vm401_vm0, %v1971_v1  ;;  %v2020_v2 = vld [vmem:[%s2935_s1 + $0x14] sm:$0xf] (!%p266_p2)  ;;  %v373_v3 = vld [vmem:[%s2935_s1] sm:$0xf] (!%p266_p2)  ;;  %vm376_vm1 = vcmask (!%p266_p2), 31744  }
   0x7   : > { %2231 = vmatpush3.msk.msra.mxu0 (!%p266_p2), %vm401_vm0, %v2010_v0  ;;  %2175 = vmatpush3.msk.msra.mxu1 (!%p266_p2), %vm401_vm0, %v1971_v1  ;;  %v2503_v10 = vld [vmem:[%s2935_s1 + $0x18] sm:$0xf] (!%p266_p2)  ;;  %v2508_v11 = vld [vmem:[%s2935_s1 + $0x8] sm:$0xf] (!%p266_p2)  ;;  %vm650_vm2 = vcmask (!%p266_p2), 1046528   ;;  %vm1802_vm3 = vcmask (!%p266_p2), 64512  }
   0x8   : > { %2244 = vmatprep.subr.msk.mxu0 (!%p266_p2), %vm401_vm0, %v2020_v2  ;;  %2188 = vmatprep.subr.msk.mxu1 (!%p266_p2), %vm401_vm0, %v373_v3  ;;  %v2624_v52 = vld [vmem:[%s2935_s1 + $0x1c] sm:$0xf] (!%p266_p2)  ;;  %v2629_v53 = vld [vmem:[%s2935_s1 + $0xc] sm:$0xf] (!%p266_p2)  ;;  %vm1804_vm4 = vcmask (!%p266_p2), 58368  }
   0xd   : > { %s2944_s28 = smov (!%p304_p3, %s1929_s28), 1 }
   0xe   : > { %s2378_s15 = smul.u32 576, %s2944_s28  ;;  %s2083_s17 = sshll.u32 %s2944_s28, 6 }
   0xf   : > { %s2379_s11 = smul.u32 160, %s2944_s28  ;;  %s2864_s25 = scalar_lea.vmem %s2942_s8, %s2083_s17 }
  0x10   : > { %s2475_s18 = scalar_lea.vmem %s2934_s0, %s2378_s15 }
  0x11   : > { %v1938_v4 = vld [vmem:[%s2475_s18 + $0x90] sm:$0xff]  ;;  %v2482_v6 = vld [vmem:[%s2475_s18 + $0xa0] sm:$0xff]  ;;  %v1948_v17 = vld [vmem:[%s2475_s18 + $0x128] sm:$0x1]  ;;  %s2793_s14 = scalar_lea.vmem %s2941_s7, %s2379_s11 }
  0x12   : > { %v2479_v5 = vld [vmem:[%s2475_s18 + $0x1b0] sm:$0xff]  ;;  %2176 = vmatprep.mubr.msk.f32.mxu1 %vm376_vm1, %v1938_v4  ;;  %v2488_v7 = vld [vmem:[%s2475_s18 + $0x1c0] sm:$0xff]  ;;  %v1102_v23 = vrot.slane %v1948_v17, 1  ;;  %v1950_v25 = vld [vmem:[%s2475_s18 + $0x138] sm:$0x1] }
  0x13   : > { %2232 = vmatprep.mubr.msk.f32.mxu0 %vm376_vm1, %v2479_v5  ;;  %v2491_v8 = vld [vmem:[%s2475_s18 + $0xb0] sm:$0xff]  ;;  %2177 = vmatmul.mubr.msk.f32.vlgmr.msra.gmra.mrb[0].mxu1 %vm376_vm1, %v2482_v6  ;;  %v2514_v12 = vld [vmem:[%s2475_s18 + $0xc0] sm:$0xff]  ;;  %v1952_v27 = vld [vmem:[%s2475_s18 + $0x148] sm:$0x1]  ;;  %v1105_v31 = vrot.slane %v1950_v25, 1 }
  0x14   : > { %v2494_v9 = vld [vmem:[%s2475_s18 + $0x1d0] sm:$0xff]  ;;  %2233 = vmatmul.mubr.msk.f32.vlgmr.msra.gmra.mrb[0].mxu0 %vm376_vm1, %v2488_v7  ;;  %2179 = vmatprep.mubr.msk.f32.mxu1 %vm376_vm1, %v2491_v8  ;;  %v2517_v13 = vld [vmem:[%s2475_s18 + $0x1e0] sm:$0xff]  ;;  %v1954_v35 = vld [vmem:[%s2475_s18 + $0x158] sm:$0x1]  ;;  %v1108_v37 = vrot.slane %v1952_v27, 1 }
  0x15   : > { %2245 = vmatpush3.msk.msra.mxu0 %vm401_vm0, %v2020_v2  ;;  %2235 = vmatprep.mubr.msk.f32.mxu0 %vm376_vm1, %v2494_v9  ;;  %v2523_v14 = vld [vmem:[%s2475_s18 + $0xd0] sm:$0xff]  ;;  %v2529_v16 = vld [vmem:[%s2475_s18 + $0x120] sm:$0xff]  ;;  %v1956_v39 = vld [vmem:[%s2475_s18 + $0x168] sm:$0x1]  ;;  %v1111_v43 = vrot.slane %v1954_v35, 1 }
  0x16   : > { %2189 = vmatpush3.msk.msra.mxu1 %vm401_vm0, %v373_v3  ;;  %v2526_v15 = vld [vmem:[%s2475_s18 + $0x1f0] sm:$0xff]  ;;  %2258 = vmatprep.subr.msk.mxu0 %vm401_vm0, %v2503_v10  ;;  %v2545_v18 = vld [vmem:[%s2475_s18 + $0xe0] sm:$0xff]  ;;  %v1101_v22 = vrot.slane %v2529_v16, 1  ;;  %v1114_v46 = vrot.slane %v1956_v39, 1  ;;  %v1958_v48 = vld [vmem:[%s2475_s18 + $0x178] sm:$0x1] }
  0x17   : > { %2202 = vmatprep.subr.msk.mxu1 %vm401_vm0, %v2508_v11  ;;  %2180 = vmatmul.mubr.msk.f32.gmra.mrb[2].mxu1 %vm376_vm1, %v2514_v12  ;;  %v2548_v19 = vld [vmem:[%s2475_s18 + $0x200] sm:$0xff]  ;;  %v2551_v20 = vld [vmem:[%s2475_s18 + $0xf0] sm:$0xff]  ;;  %v1960_v51 = vld [vmem:[%s2475_s18 + $0x188] sm:$0x1]  ;;  %v1117_v57 = vrot.slane %v1958_v48, 1 }
  0x18   : > { %2236 = vmatmul.mubr.msk.f32.gmra.mrb[2].mxu0 %vm376_vm1, %v2517_v13  ;;  %2182 = vmatprep.mubr.msk.f32.mxu1 %vm376_vm1, %v2523_v14  ;;  %v2554_v21 = vld [vmem:[%s2475_s18 + $0x210] sm:$0xff]  ;;  %v2566_v26 = vld [vmem:[%s2475_s18 + $0x140] sm:$0xff]  ;;  %v1103_v33 = vsel %vm650_vm2, %v1101_v22, %v1102_v23  ;;  %v1120_v61 = vrot.slane %v1960_v51, 1  ;;  %v1962_v63 = vld [vmem:[%s2475_s18 + $0x198] sm:$0x1] }
  0x19   : > { %2238 = vmatprep.mubr.msk.f32.mxu0 %vm376_vm1, %v2526_v15  ;;  %v2558_v24 = vld [vmem:[%s2475_s18 + $0x130] sm:$0xff]  ;;  %v2574_v28 = vld [vmem:[%s2475_s18 + $0x100] sm:$0xff]  ;;  %v1107_v36 = vrot.slane %v2566_v26, 1  ;;  %v320_v0 = vld [vmem:[%s2475_s18 + $0x8] sm:$0x1]  ;;  %v1123_v4 = vrot.slane %v1962_v63, 1 }
  0x1a   : > { %v2577_v29 = vld [vmem:[%s2475_s18 + $0x220] sm:$0xff]  ;;  %v1104_v30 = vrot.slane %v2558_v24, 1  ;;  %v2585_v34 = vld [vmem:[%s2475_s18 + $0x150] sm:$0xff]  ;;  %v652_v22 = vrot.slane %v320_v0, 1  ;;  %v322_v23 = vld [vmem:[%s2475_s18 + $0x18] sm:$0x1] }
  0x1b   : > { %2183 = vmatmul.mubr.msk.f32.gmra.mrb[4].mxu1 %vm376_vm1, %v2545_v18  ;;  %v2581_v32 = vld [vmem:[%s2475_s18] sm:$0xff]  ;;  %v2601_v40 = vld [vmem:[%s2475_s18 + $0x10] sm:$0xff]  ;;  %v1110_v42 = vrot.slane %v2585_v34, 1  ;;  %v1109_v49 = vsel %vm650_vm2, %v1107_v36, %v1108_v37  ;;  %v324_v25 = vld [vmem:[%s2475_s18 + $0x28] sm:$0x1] }
  0x1c   : > { %2239 = vmatmul.mubr.msk.f32.gmra.mrb[4].mxu0 %vm376_vm1, %v2548_v19  ;;  %2185 = vmatprep.mubr.msk.f32.mxu1 %vm376_vm1, %v2551_v20  ;;  %v2590_v38 = vld [vmem:[%s2475_s18 + $0x160] sm:$0xff]  ;;  %v1106_v41 = vsel %vm650_vm2, %v1104_v30, %v1105_v31  ;;  %v2610_v47 = vld [vmem:[%s2475_s18 + $0x170] sm:$0xff]  ;;  %v654_v27 = vrot.slane %v2601_v40, 1  ;;  %v658_v36 = vrot.slane %v324_v25, 1  ;;  %v326_v37 = vld [vmem:[%s2475_s18 + $0x38] sm:$0x1] }
  0x1d   : > { %2241 = vmatprep.mubr.msk.f32.mxu0 %vm376_vm1, %v2554_v21  ;;  %v2606_v44 = vld [vmem:[%s2475_s18 + $0x20] sm:$0xff]  ;;  %v1113_v45 = vrot.slane %v2590_v38, 1  ;;  %v2636_v54 = vld [vmem:[%s2475_s18 + $0x30] sm:$0xff]  ;;  %v1112_v55 = vsel %vm650_vm2, %v1110_v42, %v1111_v43  ;;  %v1116_v56 = vrot.slane %v2610_v47, 1  ;;  %v328_v39 = vld [vmem:[%s2475_s18 + $0x48] sm:$0x1] }
  0x1e   : > { %v2615_v50 = vld [vmem:[%s2475_s18 + $0x180] sm:$0xff]  ;;  %v2649_v62 = vld [vmem:[%s2475_s18 + $0x190] sm:$0xff]  ;;  %v661_v43 = vrot.slane %v326_v37, 1  ;;  %v664_v48 = vrot.slane %v328_v39, 1  ;;  %v332_v51 = vld [vmem:[%s2475_s18 + $0x68] sm:$0x1] }
  0x1f   : > { %2186 = vmatmul.mubr.msk.f32.gmra.mrb[6].mxu1 %vm376_vm1, %v2574_v28  ;;  %v2644_v58 = vld [vmem:[%s2475_s18 + $0x40] sm:$0xff]  ;;  %v1115_v59 = vsel %vm650_vm2, %v1113_v45, %v1114_v46  ;;  %v1119_v60 = vrot.slane %v2615_v50, 1  ;;  %v329_v1 = vld [vmem:[%s2475_s18 + $0x50] sm:$0xff]  ;;  %v1118_v2 = vsel %vm650_vm2, %v1116_v56, %v1117_v57  ;;  %v1122_v3 = vrot.slane %v2649_v62, 1  ;;  %v334_v63 = vld [vmem:[%s2475_s18 + $0x78] sm:$0x1] }
  0x20   : > { %2242 = vmatmul.mubr.msk.f32.gmra.mrb[6].mxu0 %vm376_vm1, %v2577_v29  ;;  %2190 = vmatprep.mubr.msk.f32.mxu1 %vm376_vm1, %v2581_v32  ;;  %v333_v30 = vld [vmem:[%s2475_s18 + $0x70] sm:$0xff]  ;;  %v663_v45 = vrot.slane %v2644_v58, 1  ;;  %v666_v56 = vrot.slane %v329_v1, 1 }
  0x21   : > { %2246 = vmatprep.mubr.msk.f32.mxu0 %vm376_vm1, %v1103_v33  ;;  %v1121_v17 = vsel %vm650_vm2, %v1119_v60, %v1120_v61  ;;  %v1124_v31 = vsel %vm650_vm2, %v1122_v3, %v1123_v4  ;;  %v657_v33 = vrot.slane %v2606_v44, 1  ;;  %v670_v61 = vrot.slane %v332_v51, 1 }
  0x23   : > { %2191 = vmatmul.mubr.msk.f32.vlgmr.msra.gmra.mrb[0].mxu1 %vm376_vm1, %v2601_v40  ;;  %v659_v46 = vsel %vm650_vm2, %v657_v33, %v658_v36 }
  0x24   : > { %2247 = vmatmul.mubr.msk.f32.vlgmr.msra.gmra.mrb[0].mxu0 %vm376_vm1, %v1106_v41  ;;  %2193 = vmatprep.mubr.msk.f32.mxu1 %vm376_vm1, %v2606_v44  ;;  %v660_v41 = vrot.slane %v2636_v54, 1 }
  0x25   : > { %2259 = vmatpush3.msk.msra.mxu0 %vm401_vm0, %v2503_v10  ;;  %2249 = vmatprep.mubr.msk.f32.mxu0 %vm376_vm1, %v1109_v49  ;;  %v651_v10 = vrot.slane %v2581_v32, 1  ;;  %v655_v32 = vrot.slane %v322_v23, 1  ;;  %v330_v49 = vld [vmem:[%s2475_s18 + $0x58] sm:$0x1] }
  0x26   : > { %2203 = vmatpush3.msk.msra.mxu1 %vm401_vm0, %v2508_v11  ;;  %2272 = vmatprep.subr.msk.mxu0 %vm401_vm0, %v2624_v52  ;;  %v331_v11 = vld [vmem:[%s2475_s18 + $0x60] sm:$0xff]  ;;  %v662_v57 = vsel %vm650_vm2, %v660_v41, %v661_v43 }
  0x27   : > { %2216 = vmatprep.subr.msk.mxu1 %vm401_vm0, %v2629_v53  ;;  %2194 = vmatmul.mubr.msk.f32.gmra.mrb[2].mxu1 %vm376_vm1, %v2636_v54  ;;  %v653_v35 = vsel %vm650_vm2, %v651_v10, %v652_v22  ;;  %v656_v42 = vsel %vm650_vm2, %v654_v27, %v655_v32  ;;  %v669_v60 = vrot.slane %v331_v11, 1 }
  0x28   : > { %2250 = vmatmul.mubr.msk.f32.gmra.mrb[2].mxu0 %vm376_vm1, %v1112_v55  ;;  %2196 = vmatprep.mubr.msk.f32.mxu1 %vm376_vm1, %v2644_v58  ;;  %v1663_v55 = vld [vmem:[%s2938_s4] sm:$0xf] }
  0x29   : > { %2252 = vmatprep.mubr.msk.f32.mxu0 %vm376_vm1, %v1115_v59  ;;  %v667_v59 = vrot.slane %v330_v49, 1  ;;  %v671_v0 = vsel %vm650_vm2, %v669_v60, %v670_v61 }
  0x2b   : > { %2197 = vmatmul.mubr.msk.f32.gmra.mrb[4].mxu1 %vm376_vm1, %v329_v1 }
  0x2c   : > { %2253 = vmatmul.mubr.msk.f32.gmra.mrb[4].mxu0 %vm376_vm1, %v1118_v2  ;;  %2199 = vmatprep.mubr.msk.f32.mxu1 %vm376_vm1, %v331_v11  ;;  %v335_v2 = vld [vmem:[%s2475_s18 + $0x80] sm:$0xff] }
  0x2d   : > { %2255 = vmatprep.mubr.msk.f32.mxu0 %vm376_vm1, %v1121_v17 }
  0x2f   : > { %2200 = vmatmul.mubr.msk.f32.gmra.mrb[6].mxu1 %vm376_vm1, %v333_v30 }
  0x30   : > { %2256 = vmatmul.mubr.msk.f32.gmra.mrb[6].mxu0 %vm376_vm1, %v1124_v31  ;;  %2204 = vmatprep.mubr.msk.f32.mxu1 %vm376_vm1, %v653_v35 }
  0x31   : > { %2260 = vmatprep.mubr.msk.f32.mxu0 %vm376_vm1, %v2601_v40  ;;  %v2050_v40 = vld [vmem:[%s2935_s1 + $0x20] sm:$0xf] }
  0x33   : > { %2205 = vmatmul.mubr.msk.f32.vlgmr.msra.gmra.mrb[0].mxu1 %vm376_vm1, %v656_v42 }
  0x34   : > { %2261 = vmatmul.mubr.msk.f32.vlgmr.msra.gmra.mrb[0].mxu0 %vm376_vm1, %v2606_v44  ;;  %2207 = vmatprep.mubr.msk.f32.mxu1 %vm376_vm1, %v659_v46  ;;  %v665_v44 = vsel %vm650_vm2, %v663_v45, %v664_v48 }
  0x35   : > { %2273 = vmatpush3.msk.msra.mxu0 %vm401_vm0, %v2624_v52  ;;  %2263 = vmatprep.mubr.msk.f32.mxu0 %vm376_vm1, %v2636_v54  ;;  %v672_v52 = vrot.slane %v333_v30, 1  ;;  %v673_v54 = vrot.slane %v334_v63, 1 }
  0x36   : > { %2217 = vmatpush3.msk.msra.mxu1 %vm401_vm0, %v2629_v53  ;;  %2286 = vmatprep.subr.msk.mxu0 %vm401_vm0, %v2050_v40  ;;  %v668_v53 = vsel %vm650_vm2, %v666_v56, %v667_v59 }
  0x37   : > { %2300 = vmatprep.subr.msk.mxu1 %vm401_vm0, %v1663_v55  ;;  %2208 = vmatmul.mubr.msk.f32.gmra.mrb[2].mxu1 %vm376_vm1, %v662_v57 }
  0x38   : > { %2264 = vmatmul.mubr.msk.f32.gmra.mrb[2].mxu0 %vm376_vm1, %v2644_v58  ;;  %2210 = vmatprep.mubr.msk.f32.mxu1 %vm376_vm1, %v665_v44  ;;  %v674_v58 = vsel %vm650_vm2, %v672_v52, %v673_v54 }
  0x39   : > { %2266 = vmatprep.mubr.msk.f32.mxu0 %vm376_vm1, %v329_v1  ;;  %v2859_v1 = vld [vmem:[%s2937_s3] ss:$0 sm:$0xff] }
  0x3b   : > { %2211 = vmatmul.mubr.msk.f32.gmra.mrb[4].mxu1 %vm376_vm1, %v668_v53 }
  0x3c   : > { %2267 = vmatmul.mubr.msk.f32.gmra.mrb[4].mxu0 %vm376_vm1, %v331_v11  ;;  %2213 = vmatprep.mubr.msk.f32.mxu1 %vm376_vm1, %v671_v0 }
  0x3d   : > { %2269 = vmatprep.mubr.msk.f32.mxu0 %vm376_vm1, %v333_v30 }
  0x3f   : > { %2214 = vmatmul.mubr.msk.f32.gmra.mrb[6].mxu1 %vm376_vm1, %v674_v58 }
  0x40   : > { %2270 = vmatmul.mubr.msk.f32.gmra.mrb[6].mxu0 %vm376_vm1, %v335_v2  ;;  %2218 = vmatprep.mubr.msk.f32.mxu1 %vm376_vm1, %v2529_v16 }
  0x41   : > { %2274 = vmatprep.mubr.msk.f32.mxu0 %vm376_vm1, %v2482_v6  ;;  %v1946_v6 = vld [vmem:[%s2475_s18 + $0x110] sm:$0xff] }
  0x43   : > { %2219 = vmatmul.mubr.msk.f32.vlgmr.msra.gmra.mrb[0].mxu1 %vm376_vm1, %v2558_v24  ;;  %v2842_v24 = vld [vmem:[%s2939_s5] ss:$0 sm:$0xff] }
  0x44   : > { %2275 = vmatmul.mubr.msk.f32.vlgmr.msra.gmra.mrb[0].mxu0 %vm376_vm1, %v2491_v8  ;;  %2221 = vmatprep.mubr.msk.f32.mxu1 %vm376_vm1, %v2566_v26  ;;  %v336_v8 = vld [vmem:[%s2475_s18 + $0x88] sm:$0x1] }
  0x45   : > { %2287 = vmatpush3.msk.msra.mxu0 %vm401_vm0, %v2050_v40  ;;  %2277 = vmatprep.mubr.msk.f32.mxu0 %vm376_vm1, %v2514_v12  ;;  %v1502_v12 = vrot.slane %v335_v2, 1 }
  0x46   : > { %2301 = vmatpush3.msk.msra.mxu1 %vm401_vm0, %v1663_v55 }
  0x47   : > { %2222 = vmatmul.mubr.msk.f32.gmra.mrb[2].mxu1 %vm376_vm1, %v2585_v34  ;;  %v2853_v34 = vld [vmem:[%s2940_s6] ss:$0 sm:$0xff] }
  0x48   : > { %2278 = vmatmul.mubr.msk.f32.gmra.mrb[2].mxu0 %vm376_vm1, %v2523_v14  ;;  %2224 = vmatprep.mubr.msk.f32.mxu1 %vm376_vm1, %v2590_v38 }
  0x49   : > { %2280 = vmatprep.mubr.msk.f32.mxu0 %vm376_vm1, %v2545_v18 }
  0x4b   : > { %2225 = vmatmul.mubr.msk.f32.gmra.mrb[4].mxu1 %vm376_vm1, %v2610_v47 }
  0x4c   : > { %2281 = vmatmul.mubr.msk.f32.gmra.mrb[4].mxu0 %vm376_vm1, %v2551_v20  ;;  %2227 = vmatprep.mubr.msk.f32.mxu1 %vm376_vm1, %v2615_v50 }
  0x4d   : > { %2283 = vmatprep.mubr.msk.f32.mxu0 %vm376_vm1, %v2574_v28  ;;  %v2848_v28 = vld [vmem:[%s2936_s2] ss:$0 sm:$0xff] }
  0x4f   : > { %2228 = vmatmul.mubr.msk.f32.gmra.mrb[6].mxu1 %vm376_vm1, %v2649_v62 }
  0x50   : > { %2284 = vmatmul.mubr.msk.f32.gmra.mrb[6].mxu0 %vm376_vm1, %v1946_v6  ;;  %2302 = vmatprep.mubr.msk.f32.mxu1 %vm376_vm1, %v2479_v5  ;;  %v1503_v5 = vrot.slane %v336_v8, 1 }
  0x51   : > { %2288 = vmatprep.mubr.msk.f32.mxu0 %vm376_vm1, %v656_v42 }
  0x53   : > { %2303 = vmatmul.mubr.msk.f32.vlgmr.msra.gmra.mrb[8].mxu1 %vm376_vm1, %v2488_v7  ;;  %v1504_v7 = vsel %vm650_vm2, %v1502_v12, %v1503_v5 }
  0x54   : > { %2289 = vmatmul.mubr.msk.f32.vlgmr.msra.gmra.mrb[0].mxu0 %vm376_vm1, %v659_v46  ;;  %2305 = vmatprep.mubr.msk.f32.mxu1 %vm376_vm1, %v2494_v9  ;;  %v2397_v9 = vmov 0.0  }
  0x55   : > { %2291 = vmatprep.mubr.msk.f32.mxu0 %vm376_vm1, %v662_v57  ;;  %1803 = vst.msk [vmem:[%s2793_s14] sm:$0xff] %vm1802_vm3, %v2397_v9  ;;  %1808 = vst.msk [vmem:[%s2793_s14 + $0x20] sm:$0xff] %vm1802_vm3, %v2397_v9 }
  0x56   : > { %1805 = vst.msk [vmem:[%s2793_s14 + $0x8] sm:$0x3] %vm1804_vm4, %v2397_v9  ;;  %1809 = vst.msk [vmem:[%s2793_s14 + $0x28] sm:$0x3] %vm1804_vm4, %v2397_v9 }
  0x57   : > { %2306 = vmatmul.mubr.msk.f32.gmra.mrb[10].mxu1 %vm376_vm1, %v2517_v13  ;;  %1822 = vst.msk [vmem:[%s2793_s14 + $0x90] sm:$0xff] %vm1802_vm3, %v2397_v9  ;;  %1806 = vst.msk [vmem:[%s2793_s14 + $0x10] sm:$0xff] %vm1802_vm3, %v2397_v9 }
  0x58   : > { %2292 = vmatmul.mubr.msk.f32.gmra.mrb[2].mxu0 %vm376_vm1, %v665_v44  ;;  %2308 = vmatprep.mubr.msk.f32.mxu1 %vm376_vm1, %v2526_v15  ;;  %1823 = vst.msk [vmem:[%s2793_s14 + $0x98] sm:$0x3] %vm1804_vm4, %v2397_v9  ;;  %1807 = vst.msk [vmem:[%s2793_s14 + $0x18] sm:$0x3] %vm1804_vm4, %v2397_v9 }
  0x59   : > { %2294 = vmatprep.mubr.msk.f32.mxu0 %vm376_vm1, %v668_v53  ;;  %1810 = vst.msk [vmem:[%s2793_s14 + $0x30] sm:$0xff] %vm1802_vm3, %v2397_v9  ;;  %1812 = vst.msk [vmem:[%s2793_s14 + $0x40] sm:$0xff] %vm1802_vm3, %v2397_v9 }
  0x5a   : > { %1811 = vst.msk [vmem:[%s2793_s14 + $0x38] sm:$0x3] %vm1804_vm4, %v2397_v9  ;;  %1813 = vst.msk [vmem:[%s2793_s14 + $0x48] sm:$0x3] %vm1804_vm4, %v2397_v9 }
  0x5b   : > { %2309 = vmatmul.mubr.msk.f32.gmra.mrb[12].mxu1 %vm376_vm1, %v2548_v19  ;;  %1814 = vst.msk [vmem:[%s2793_s14 + $0x50] sm:$0xff] %vm1802_vm3, %v2397_v9  ;;  %1816 = vst.msk [vmem:[%s2793_s14 + $0x60] sm:$0xff] %vm1802_vm3, %v2397_v9 }
  0x5c   : > { %2295 = vmatmul.mubr.msk.f32.gmra.mrb[4].mxu0 %vm376_vm1, %v671_v0  ;;  %2311 = vmatprep.mubr.msk.f32.mxu1 %vm376_vm1, %v2554_v21  ;;  %1815 = vst.msk [vmem:[%s2793_s14 + $0x58] sm:$0x3] %vm1804_vm4, %v2397_v9  ;;  %1817 = vst.msk [vmem:[%s2793_s14 + $0x68] sm:$0x3] %vm1804_vm4, %v2397_v9 }
  0x5d   : > { %2297 = vmatprep.mubr.msk.f32.mxu0 %vm376_vm1, %v674_v58  ;;  %1818 = vst.msk [vmem:[%s2793_s14 + $0x70] sm:$0xff] %vm1802_vm3, %v2397_v9  ;;  %1820 = vst.msk [vmem:[%s2793_s14 + $0x80] sm:$0xff] %vm1802_vm3, %v2397_v9 }
  0x5e   : > { %1819 = vst.msk [vmem:[%s2793_s14 + $0x78] sm:$0x3] %vm1804_vm4, %v2397_v9  ;;  %1821 = vst.msk [vmem:[%s2793_s14 + $0x88] sm:$0x3] %vm1804_vm4, %v2397_v9 }
  0x5f   : > { %2312 = vmatmul.mubr.msk.f32.gmra.mrb[14].mxu1 %vm376_vm1, %v2577_v29 }
  0x60   : > { %2298 = vmatmul.mubr.msk.f32.gmra.mrb[6].mxu0 %vm376_vm1, %v1504_v7 }
 0x116   : > { %v2220_v13 = vpop.f32.mrb[0].mxu1 }
 0x117   : > { %v904_v14 = vpop.f32.mrb[1].mxu1 }
 0x11a   : > { %v2223_v15 = vpop.f32.mrb[2].mxu1 }
 0x11b   : > { %v914_v16 = vpop.f32.mrb[3].mxu1 }
 0x11e   : > { %v2226_v18 = vpop.f32.mrb[4].mxu1 }
 0x11f   : > { %v924_v19 = vpop.f32.mrb[5].mxu1 }
 0x122   : > { %v2835_v20 = vpop.f32.mrb[6].mxu1 }
 0x123   : > { %v2837_v21 = vpop.f32.mrb[7].mxu1 }
 0x126   : > { %v2304_v29 = vpop.f32.mrb[8].mxu1 }
 0x127   : > { %v2290_v26 = vpop.f32.mrb[0].mxu0  ;;  %v1780_v50 = vmul.f32 %v2304_v29, %v2842_v24  ;;  %v1733_v62 = vpop.f32.mrb[9].mxu1 }
 0x128   : > { %v2314_v38 = vadd.f32 %v2290_v26, %v2220_v13  ;;  %v1578_v47 = vpop.f32.mrb[1].mxu0  ;;  %v1779_v4 = vmul.f32 %v2842_v24, %v1733_v62 }
 0x129   : > { %v2315_v3 = vadd.f32 %v1578_v47, %v904_v14  ;;  %v1795_v11 = vadd.f32 %v2853_v34, %v1780_v50 }
 0x12a   : > { %v1633_v10 = vmul.f32 %v2314_v38, %v2848_v28  ;;  %v1794_v23 = vadd.f32 %v2853_v34, %v1779_v4  ;;  %v2307_v25 = vpop.f32.mrb[10].mxu1 }
 0x12b   : > { %v1632_v17 = vmul.f32 %v2315_v3, %v2848_v28  ;;  %v2293_v22 = vpop.f32.mrb[2].mxu0  ;;  %1834 = vst.msk [vmem:[%s2864_s25 + $0x8] sm:$0xff] %vm1802_vm3, %v1795_v11  ;;  %v1782_v32 = vmul.f32 %v2307_v25, %v2842_v24  ;;  %v1743_v33 = vpop.f32.mrb[11].mxu1 }
 0x12c   : > { %v1648_v27 = vadd.f32 %v2859_v1, %v1633_v10  ;;  %v2316_v30 = vadd.f32 %v2293_v22, %v2223_v15  ;;  %v1588_v31 = vpop.f32.mrb[3].mxu0  ;;  %1833 = vst.msk [vmem:[%s2864_s25] sm:$0xff] %vm1802_vm3, %v1794_v23  ;;  %v1781_v37 = vmul.f32 %v2842_v24, %v1743_v33 }
 0x12d   : > { %v1647_v35 = vadd.f32 %v2859_v1, %v1632_v17  ;;  %v2317_v36 = vadd.f32 %v1588_v31, %v914_v16  ;;  %v1797_v42 = vadd.f32 %v2853_v34, %v1782_v32 }
 0x12e   : > { %v1656_v39 = vmax.f32 %v1648_v27, 0.0  ;;  %v1635_v41 = vmul.f32 %v2316_v30, %v2848_v28  ;;  %v1796_v48 = vadd.f32 %v2853_v34, %v1781_v37  ;;  %v2310_v49 = vpop.f32.mrb[12].mxu1 }
 0x12f   : > { %v1655_v43 = vmax.f32 %v1647_v35, 0.0  ;;  %v1634_v45 = vmul.f32 %v2317_v36, %v2848_v28  ;;  %v2296_v46 = vpop.f32.mrb[4].mxu0  ;;  %1836 = vst.msk [vmem:[%s2864_s25 + $0x18] sm:$0xff] %vm1802_vm3, %v1797_v42  ;;  %v1784_v56 = vmul.f32 %v2310_v49, %v2842_v24  ;;  %v1753_v57 = vpop.f32.mrb[13].mxu1 }
 0x130   : > { %2074 = vst.msk [vmem:[%s2793_s14 + $0x21] sm:$0xff] %vm1802_vm3, %v1656_v39  ;;  %v1650_v51 = vadd.f32 %v2859_v1, %v1635_v41  ;;  %v2318_v40 = vadd.f32 %v2296_v46, %v2226_v18  ;;  %v1598_v55 = vpop.f32.mrb[5].mxu0  ;;  %1835 = vst.msk [vmem:[%s2864_s25 + $0x10] sm:$0xff] %vm1802_vm3, %v1796_v48  ;;  %v1783_v44 = vmul.f32 %v2842_v24, %v1753_v57 }
 0x131   : > { %2073 = vst.msk [vmem:[%s2793_s14 + $0x11] sm:$0xff] %vm1802_vm3, %v1655_v43  ;;  %v1649_v59 = vadd.f32 %v2859_v1, %v1634_v45  ;;  %v2319_v60 = vadd.f32 %v1598_v55, %v924_v19  ;;  %v1799_v52 = vadd.f32 %v2853_v34, %v1784_v56 }
 0x132   : > { %v1658_v61 = vmax.f32 %v1650_v51, 0.0  ;;  %v1637_v63 = vmul.f32 %v2318_v40, %v2848_v28  ;;  %v1798_v58 = vadd.f32 %v2853_v34, %v1783_v44  ;;  %v2313_v2 = vpop.f32.mrb[14].mxu1 }
 0x133   : > { %v1657_v53 = vmax.f32 %v1649_v59, 0.0  ;;  %v1636_v54 = vmul.f32 %v2319_v60, %v2848_v28  ;;  %v2299_v0 = vpop.f32.mrb[6].mxu0  ;;  %1838 = vst.msk [vmem:[%s2864_s25 + $0x28] sm:$0xff] %vm1802_vm3, %v1799_v52  ;;  %v1786_v5 = vmul.f32 %v2313_v2, %v2842_v24  ;;  %v1763_v7 = vpop.f32.mrb[15].mxu1 }
 0x134   : > { %2076 = vst.msk [vmem:[%s2793_s14 + $0x41] sm:$0xff] %vm1802_vm3, %v1658_v61  ;;  %v1652_v6 = vadd.f32 %v2859_v1, %v1637_v63  ;;  %v2320_v8 = vadd.f32 %v2299_v0, %v2835_v20  ;;  %v1608_v12 = vpop.f32.mrb[7].mxu0  ;;  %1837 = vst.msk [vmem:[%s2864_s25 + $0x20] sm:$0xff] %vm1802_vm3, %v1798_v58  ;;  %v1785_v14 = vmul.f32 %v2842_v24, %v1763_v7 }
 0x135   : > { %2075 = vst.msk [vmem:[%s2793_s14 + $0x31] sm:$0xff] %vm1802_vm3, %v1657_v53  ;;  %v1651_v9 = vadd.f32 %v2859_v1, %v1636_v54  ;;  %v2321_v13 = vadd.f32 %v1608_v12, %v2837_v21  ;;  %v1801_v18 = vadd.f32 %v2853_v34, %v1786_v5 }
 0x136   : > { %v1660_v15 = vmax.f32 %v1652_v6, 0.0  ;;  %v1639_v16 = vmul.f32 %v2320_v8, %v2848_v28  ;;  %v1800_v26 = vadd.f32 %v2853_v34, %v1785_v14 }
 0x137   : > { %v1659_v19 = vmax.f32 %v1651_v9, 0.0  ;;  %v1638_v20 = vmul.f32 %v2321_v13, %v2848_v28  ;;  %1840 = vst.msk [vmem:[%s2864_s25 + $0x38] sm:$0xff] %vm1802_vm3, %v1801_v18 }
 0x138   : > { %2078 = vst.msk [vmem:[%s2793_s14 + $0x61] sm:$0xff] %vm1802_vm3, %v1660_v15  ;;  %v1654_v29 = vadd.f32 %v2859_v1, %v1639_v16  ;;  %1839 = vst.msk [vmem:[%s2864_s25 + $0x30] sm:$0xff] %vm1802_vm3, %v1800_v26 }
 0x139   : > { %2077 = vst.msk [vmem:[%s2793_s14 + $0x51] sm:$0xff] %vm1802_vm3, %v1659_v19  ;;  %v1653_v21 = vadd.f32 %v2859_v1, %v1638_v20 }
 0x13a   : > { %v1662_v24 = vmax.f32 %v1654_v29, 0.0 }
 0x13b   : > { %v1661_v38 = vmax.f32 %v1653_v21, 0.0 }
 0x13c   : > { %2080 = vst.msk [vmem:[%s2793_s14 + $0x81] sm:$0xff] %vm1802_vm3, %v1662_v24 }
 0x13d   : > { %2079 = vst.msk [vmem:[%s2793_s14 + $0x71] sm:$0xff] %vm1802_vm3, %v1661_v38 }
 0x13e PF: > { %s19_s27 = sadd.s32 1, %s2395_s27  }
 0x13f   : > { %p16_p4 = scmp.ge.s32.totalorder %s19_s27, 4  }
 0x141   :  { %18 = sbr.rel (!%p16_p4) target bundleno = 1 (0x1), region = 102 }

</bundles_post_ra>
